<compile_context>
chip_gen: v7x
topology: tpu7x:2x2x1
jax: 0.10.0
libtpu: 0.0.40
codegen_flags: <defaults>
</compile_context>

<pallas_src>
import functools

import jax
import jax.numpy as jnp
from jax.experimental import pallas as pl
from jax.experimental.pallas import tpu as pltpu

# Encoder: 784 -> 128 -> 64 -> 16 -> 2   (Tanh between, none after last)
# Decoder:   2 -> 16  -> 64 -> 128 -> 784 (Tanh between, Sigmoid after last)
ENC_DIMS = [784, 128, 64, 16, 2]
DEC_DIMS = [2, 16, 64, 128, 784]

FEAT = 784
FEAT_PAD = 896   # 7 * 128: lane-dense padding of the 784 feature dimension
CODE = 2
CODE_PAD = 128   # lane-dense padding of the 2-wide code dimension


def autoencoder_kernel(x_ref,
                       # encoder params
                       ew1, eb1, ew2, eb2, ew3, eb3, ew4, eb4,
                       # decoder params
                       dw1, db1, dw2, db2, dw3, db3, dw4, db4,
                       # outputs
                       codes_ref, dec_ref,
                       *, act_dtype):
    """One batch tile: full encoder + decoder, all weights resident in VMEM.

    Matmul operands are cast to the weight dtype (f32 or bf16); MXU
    accumulation stays f32 via preferred_element_type, and the bias add is
    done in f32.  Transcendentals (tanh/sigmoid) run in `act_dtype`: bf16 on
    bf16-EUP chips (v6e/v7x, ~2x EUP throughput and the cast for the next
    matmul becomes free) and f32 on v5e.
    """
    wdt = ew1.dtype

    def dense(h, w_ref, b_ref):
        return jnp.dot(h.astype(wdt), w_ref[...],
                       preferred_element_type=jnp.float32) + b_ref[...]

    def act(z, fn):
        return fn(z.astype(act_dtype))

    x = x_ref[...]

    # ----- encoder: 896(pad of 784) -> 128 -> 64 -> 16 -> 128(pad of 2) -----
    h = act(dense(x, ew1, eb1), jnp.tanh)
    h = act(dense(h, ew2, eb2), jnp.tanh)
    h = act(dense(h, ew3, eb3), jnp.tanh)
    codes = dense(h, ew4, eb4)                       # f32, no activation
    codes_ref[...] = codes.astype(codes_ref.dtype)   # lane-dense unmasked store

    # ----- decoder: 128(pad of 2) -> 16 -> 64 -> 128 -> 896(pad of 784) -----
    g = act(dense(codes, dw1, db1), jnp.tanh)
    g = act(dense(g, dw2, db2), jnp.tanh)
    g = act(dense(g, dw3, db3), jnp.tanh)
    logits = dense(g, dw4, db4)
    dec_ref[...] = act(logits, jax.nn.sigmoid).astype(dec_ref.dtype)


def init_linear(key, in_f, out_f):
    """PyTorch-style uniform(-1/sqrt(in), 1/sqrt(in)) init; weight stored as (in, out)."""
    kw, kb = jax.random.split(key)
    bound = 1.0 / (in_f ** 0.5)
    w = jax.random.uniform(kw, (in_f, out_f), jnp.float32, -bound, bound)
    b = jax.random.uniform(kb, (1, out_f), jnp.float32, -bound, bound)
    return w, b


def init_params(key):
    params = []
    keys = jax.random.split(key, 8)
    k_idx = 0
    for dims in (ENC_DIMS, DEC_DIMS):
        for i in range(len(dims) - 1):
            w, b = init_linear(keys[k_idx], dims[i], dims[i + 1])
            params.extend([w, b])
            k_idx += 1
    return params  # [ew1, eb1, ..., ew4, eb4, dw1, db1, ..., dw4, db4]


def _pad_and_cast_params(params, compute_dtype):
    """Zero-pad 784 -> 896 and 2 -> 128 dims (exact math), cast weights.

    Zero padding keeps every result exact:
      x_pad @ ew1_pad           == x @ ew1              (extra rows of ew1 are 0)
      (h @ ew4_pad + eb4_pad)   == [h @ ew4 + eb4, 0..] (codes lanes 2..127 are 0)
      codes_pad @ dw1_pad       == codes @ dw1          (extra rows of dw1 are 0)
      (g @ dw4_pad + db4_pad)[:, :784] == g @ dw4 + db4
    """
    (ew1, eb1, ew2, eb2, ew3, eb3, ew4, eb4,
     dw1, db1, dw2, db2, dw3, db3, dw4, db4) = params
    fpad = FEAT_PAD - FEAT
    cpad = CODE_PAD - CODE
    ew1 = jnp.pad(ew1, ((0, fpad), (0, 0)))
    ew4 = jnp.pad(ew4, ((0, 0), (0, cpad)))
    eb4 = jnp.pad(eb4, ((0, 0), (0, cpad)))
    dw1 = jnp.pad(dw1, ((0, cpad), (0, 0)))
    dw4 = jnp.pad(dw4, ((0, 0), (0, fpad)))
    db4 = jnp.pad(db4, ((0, 0), (0, fpad)))
    weights = [w.astype(compute_dtype)
               for w in (ew1, ew2, ew3, ew4, dw1, dw2, dw3, dw4)]
    biases = [eb1, eb2, eb3, eb4, db1, db2, db3, db4]  # keep f32 bias-add path
    out = []
    for w, b in zip(weights, biases):
        out.extend([w, b])
    return out


def _round_up(n, m):
    return ((n + m - 1) // m) * m


def _choose_block_b(B, block_b):
    """Pick the effective batch tile.

    * Shrink the tile instead of padding when B < block_b (no 16x wasted MXU /
      EUP / HBM-write work for small inference batches).
    * Guarantee >= 2 grid steps whenever B > 8 rows so the "parallel" batch
      axis can be sharded across both v7x TensorCores.
    """
    bb = max(8, min(block_b, _round_up(B, 8)))
    steps = -(-B // bb)
    if steps == 1 and bb > 8:
        bb = max(8, _round_up(-(-B // 2), 8))
    return bb


def _vmem_limit_bytes(block_b, compute_dtype, decoded_dtype, param_bytes):
    """Actual double-buffered footprint + headroom, capped below v7x's 64 MiB."""
    cit = jnp.dtype(compute_dtype).itemsize
    dit = jnp.dtype(decoded_dtype).itemsize
    x_tile = block_b * FEAT_PAD * cit
    dec_tile = block_b * FEAT_PAD * dit
    codes_tile = block_b * CODE_PAD * 4
    total = 2 * (x_tile + dec_tile + codes_tile + param_bytes)  # double-buffered
    total += 8 * 1024 * 1024  # Mosaic internal scratch / headroom
    return int(min(max(total, 16 * 1024 * 1024), 48 * 1024 * 1024))


def _chip_has_bf16_eup():
    """True on v6e/v7x (bf16 VPU/EUP); False on v5e and older."""
    try:
        kind = jax.devices()[0].device_kind.lower()
    except Exception:
        return False
    return not any(old in kind for old in ("v2", "v3", "v4", "v5"))


@functools.partial(
    jax.jit,
    static_argnames=("block_b", "compute_dtype", "act_dtype", "decoded_dtype"))
def _autoencoder_forward_impl(x, params, *, block_b, compute_dtype, act_dtype,
                              decoded_dtype):
    B, D = x.shape
    assert D == FEAT

    B_pad = _round_up(B, block_b)
    x_pad = jnp.pad(x, ((0, B_pad - B), (0, FEAT_PAD - FEAT))).astype(compute_dtype)

    kparams = _pad_and_cast_params(params, compute_dtype)
    param_bytes = sum(int(p.size) * p.dtype.itemsize for p in kparams)

    grid = (B_pad // block_b,)

    x_spec = pl.BlockSpec((block_b, FEAT_PAD), lambda i: (i, 0))
    # Parameters (~0.5-1 MB total): whole array resident every grid step.
    # (Constant index_map -> Pallas does not re-DMA them across steps; we skip
    #  pl.Buffered(1) single-buffering to keep maximum lowering compatibility.)
    param_specs = [pl.BlockSpec(p.shape, lambda i: (0, 0)) for p in kparams]
    codes_spec = pl.BlockSpec((block_b, CODE_PAD), lambda i: (i, 0))
    dec_spec = pl.BlockSpec((block_b, FEAT_PAD), lambda i: (i, 0))

    out_shape = (
        jax.ShapeDtypeStruct((B_pad, CODE_PAD), jnp.float32),     # codes (padded)
        jax.ShapeDtypeStruct((B_pad, FEAT_PAD), decoded_dtype),   # decoded (padded)
    )

    # Advisory cost estimate for XLA's scheduler (padded dims).
    macs = sum(int(w.shape[0]) * int(w.shape[1]) for w in kparams[0::2])
    tanh_per_row = 128 + 64 + 16 + 16 + 64 + 128
    cost = pl.CostEstimate(
        flops=2 * macs * B_pad,
        transcendentals=(tanh_per_row + FEAT_PAD) * B_pad,
        bytes_accessed=B_pad * (FEAT_PAD * jnp.dtype(compute_dtype).itemsize
                                + CODE_PAD * 4
                                + FEAT_PAD * jnp.dtype(decoded_dtype).itemsize)
        + param_bytes,
    )

    kernel = functools.partial(autoencoder_kernel, act_dtype=act_dtype)

    codes, decoded = pl.pallas_call(
        kernel,
        out_shape=out_shape,
        grid_spec=pltpu.PrefetchScalarGridSpec(
            num_scalar_prefetch=0,
            grid=grid,
            in_specs=[x_spec] + param_specs,
            out_specs=[codes_spec, dec_spec],
        ),
        compiler_params=pltpu.CompilerParams(
            dimension_semantics=("parallel",),
            vmem_limit_bytes=_vmem_limit_bytes(block_b, compute_dtype,
                                               decoded_dtype, param_bytes),
        ),
        cost_estimate=cost,
    )(x_pad, *kparams)

    # Strip batch padding and the lane padding of the 2 / 784 dims.
    return codes[:B, :CODE], decoded[:B, :FEAT]


def autoencoder_forward(x, params, *, block_b=512,
                        compute_dtype=jnp.bfloat16,
                        bf16_activations=None,
                        decoded_dtype=None):
    """Forward pass.  Performance default: bf16 matmuls + bf16 decoded store,
    with bf16 activations auto-enabled on v6e/v7x (f32 on v5e).  Pass
    compute_dtype=jnp.float32, bf16_activations=False for an exact f32 path."""
    compute_dtype = jnp.dtype(compute_dtype)
    if bf16_activations is None:
        bf16_activations = (compute_dtype == jnp.dtype(jnp.bfloat16)
                            and _chip_has_bf16_eup())
    act_dtype = jnp.dtype(jnp.bfloat16) if bf16_activations else jnp.dtype(jnp.float32)
    if decoded_dtype is None:
        decoded_dtype = (jnp.dtype(jnp.bfloat16)
                         if compute_dtype == jnp.dtype(jnp.bfloat16)
                         else jnp.dtype(jnp.float32))
    decoded_dtype = jnp.dtype(decoded_dtype)

    block_b_eff = _choose_block_b(x.shape[0], block_b)
    return _autoencoder_forward_impl(
        x, params,
        block_b=block_b_eff,
        compute_dtype=compute_dtype,
        act_dtype=act_dtype,
        decoded_dtype=decoded_dtype,
    )


def reference_forward(x, params):
    """Pure-JAX f32 reference of the same forward (for sanity checking)."""
    ew1, eb1, ew2, eb2, ew3, eb3, ew4, eb4, \
        dw1, db1, dw2, db2, dw3, db3, dw4, db4 = params
    h = jnp.tanh(x @ ew1 + eb1)
    h = jnp.tanh(h @ ew2 + eb2)
    h = jnp.tanh(h @ ew3 + eb3)
    codes = h @ ew4 + eb4
    g = jnp.tanh(codes @ dw1 + db1)
    g = jnp.tanh(g @ dw2 + db2)
    g = jnp.tanh(g @ dw3 + db3)
    decoded = jax.nn.sigmoid(g @ dw4 + db4)
    return codes, decoded


if __name__ == "__main__":
    key = jax.random.PRNGKey(0)
    k_params, k_x = jax.random.split(key)

    params = init_params(k_params)

    B = 16
    x = jax.random.uniform(k_x, (B, 784), jnp.float32)  # MNIST-like flattened input

    ref_codes, ref_decoded = reference_forward(x, params)

    # Exact f32 validation path (f32 matmuls, f32 activations, f32 outputs).
    # B=16 -> 8-row tile, 2 grid steps: also exercises pipelining / sharding.
    codes, decoded = autoencoder_forward(x, params,
                                         compute_dtype=jnp.float32,
                                         bf16_activations=False)
    jax.block_until_ready((codes, decoded))
    assert codes.shape == (B, 2) and decoded.shape == (B, 784)
    assert jnp.allclose(codes, ref_codes, atol=1e-5, rtol=1e-5)
    assert jnp.allclose(decoded, ref_decoded, atol=1e-5, rtol=1e-5)

    # Performance-default path: bf16 matmuls, bf16 decoded store, bf16
    # activations on v6e/v7x (auto-falls back to f32 activations on v5e).
    # Note: x is quantized to bf16 before the first matmul, so errors include
    # input quantization; 5e-2 tolerance covers it.
    codes_bf, dec_bf = autoencoder_forward(x, params)
    jax.block_until_ready((codes_bf, dec_bf))
    assert codes_bf.shape == (B, 2) and dec_bf.shape == (B, 784)
    assert jnp.allclose(codes_bf, ref_codes, atol=5e-2, rtol=5e-2)
    assert jnp.allclose(dec_bf.astype(jnp.float32), ref_decoded,
                        atol=5e-2, rtol=5e-2)

    print("KERNEL_OK")
</pallas_src>

<mosaic_0001>
module attributes {stable_mosaic.version = 11 : i64} {
  func.func @autoencoder_kernel(%arg0: i32, %arg1: memref<8x896xf32, #tpu.memory_space<vmem>>, %arg2: memref<896x128xf32, #tpu.memory_space<vmem>>, %arg3: memref<1x128xf32, #tpu.memory_space<vmem>>, %arg4: memref<128x64xf32, #tpu.memory_space<vmem>>, %arg5: memref<1x64xf32, #tpu.memory_space<vmem>>, %arg6: memref<64x16xf32, #tpu.memory_space<vmem>>, %arg7: memref<1x16xf32, #tpu.memory_space<vmem>>, %arg8: memref<16x128xf32, #tpu.memory_space<vmem>>, %arg9: memref<1x128xf32, #tpu.memory_space<vmem>>, %arg10: memref<128x16xf32, #tpu.memory_space<vmem>>, %arg11: memref<1x16xf32, #tpu.memory_space<vmem>>, %arg12: memref<16x64xf32, #tpu.memory_space<vmem>>, %arg13: memref<1x64xf32, #tpu.memory_space<vmem>>, %arg14: memref<64x128xf32, #tpu.memory_space<vmem>>, %arg15: memref<1x128xf32, #tpu.memory_space<vmem>>, %arg16: memref<128x896xf32, #tpu.memory_space<vmem>>, %arg17: memref<1x896xf32, #tpu.memory_space<vmem>>, %arg18: memref<8x128xf32, #tpu.memory_space<vmem>>, %arg19: memref<8x896xf32, #tpu.memory_space<vmem>>) attributes {dimension_semantics = [#tpu.dimension_semantics<parallel>], iteration_bounds = array<i64: 2>, scalar_prefetch = 0 : i64, scratch_operands = 0 : i64, tpu.core_type = #tpu.core_type<tc>, window_params = [{transform_indices = @transform_0, window_bounds = array<i64: 8, 896>}, {pipeline_mode = #tpu.pipeline_mode<synchronous>, transform_indices = @transform_1, window_bounds = array<i64: 896, 128>}, {pipeline_mode = #tpu.pipeline_mode<synchronous>, transform_indices = @transform_2, window_bounds = array<i64: 1, 128>}, {pipeline_mode = #tpu.pipeline_mode<synchronous>, transform_indices = @transform_3, window_bounds = array<i64: 128, 64>}, {pipeline_mode = #tpu.pipeline_mode<synchronous>, transform_indices = @transform_4, window_bounds = array<i64: 1, 64>}, {pipeline_mode = #tpu.pipeline_mode<synchronous>, transform_indices = @transform_5, window_bounds = array<i64: 64, 16>}, {pipeline_mode = #tpu.pipeline_mode<synchronous>, transform_indices = @transform_6, window_bounds = array<i64: 1, 16>}, {pipeline_mode = #tpu.pipeline_mode<synchronous>, transform_indices = @transform_7, window_bounds = array<i64: 16, 128>}, {pipeline_mode = #tpu.pipeline_mode<synchronous>, transform_indices = @transform_8, window_bounds = array<i64: 1, 128>}, {pipeline_mode = #tpu.pipeline_mode<synchronous>, transform_indices = @transform_9, window_bounds = array<i64: 128, 16>}, {pipeline_mode = #tpu.pipeline_mode<synchronous>, transform_indices = @transform_10, window_bounds = array<i64: 1, 16>}, {pipeline_mode = #tpu.pipeline_mode<synchronous>, transform_indices = @transform_11, window_bounds = array<i64: 16, 64>}, {pipeline_mode = #tpu.pipeline_mode<synchronous>, transform_indices = @transform_12, window_bounds = array<i64: 1, 64>}, {pipeline_mode = #tpu.pipeline_mode<synchronous>, transform_indices = @transform_13, window_bounds = array<i64: 64, 128>}, {pipeline_mode = #tpu.pipeline_mode<synchronous>, transform_indices = @transform_14, window_bounds = array<i64: 1, 128>}, {pipeline_mode = #tpu.pipeline_mode<synchronous>, transform_indices = @transform_15, window_bounds = array<i64: 128, 896>}, {pipeline_mode = #tpu.pipeline_mode<synchronous>, transform_indices = @transform_16, window_bounds = array<i64: 1, 896>}, {transform_indices = @transform_17, window_bounds = array<i64: 8, 128>}, {transform_indices = @transform_18, window_bounds = array<i64: 8, 896>}]} {
    %c0 = arith.constant 0 : index
    %c0_0 = arith.constant 0 : index
    %0 = vector.load %arg1[%c0, %c0_0] : memref<8x896xf32, #tpu.memory_space<vmem>>, vector<8x896xf32>
    %c0_1 = arith.constant 0 : index
    %c0_2 = arith.constant 0 : index
    %1 = vector.load %arg2[%c0_1, %c0_2] : memref<896x128xf32, #tpu.memory_space<vmem>>, vector<896x128xf32>
    %cst = arith.constant dense<0.000000e+00> : vector<8x128xf32>
    %2 = tpu.matmul %0, %1, %cst {dimension_numbers = #tpu.dot_dimension_numbers<[1], [0], [0], [1], [0, 0, 1, 1], [], []>} : vector<8x896xf32>, vector<896x128xf32>, vector<8x128xf32> -> vector<8x128xf32>
    %c0_3 = arith.constant 0 : index
    %c0_4 = arith.constant 0 : index
    %3 = vector.load %arg3[%c0_3, %c0_4] : memref<1x128xf32, #tpu.memory_space<vmem>>, vector<1x128xf32>
    %4 = vector.broadcast %3 : vector<1x128xf32> to vector<8x128xf32>
    %5 = arith.addf %2, %4 : vector<8x128xf32>
    %6 = math.tanh %5 : vector<8x128xf32>
    %c0_5 = arith.constant 0 : index
    %c0_6 = arith.constant 0 : index
    %7 = vector.load %arg4[%c0_5, %c0_6] : memref<128x64xf32, #tpu.memory_space<vmem>>, vector<128x64xf32>
    %cst_7 = arith.constant dense<0.000000e+00> : vector<8x64xf32>
    %8 = tpu.matmul %6, %7, %cst_7 {dimension_numbers = #tpu.dot_dimension_numbers<[1], [0], [0], [1], [0, 0, 1, 1], [], []>} : vector<8x128xf32>, vector<128x64xf32>, vector<8x64xf32> -> vector<8x64xf32>
    %c0_8 = arith.constant 0 : index
    %c0_9 = arith.constant 0 : index
    %9 = vector.load %arg5[%c0_8, %c0_9] : memref<1x64xf32, #tpu.memory_space<vmem>>, vector<1x64xf32>
    %10 = vector.broadcast %9 : vector<1x64xf32> to vector<8x64xf32>
    %11 = arith.addf %8, %10 : vector<8x64xf32>
    %12 = math.tanh %11 : vector<8x64xf32>
    %c0_10 = arith.constant 0 : index
    %c0_11 = arith.constant 0 : index
    %13 = vector.load %arg6[%c0_10, %c0_11] : memref<64x16xf32, #tpu.memory_space<vmem>>, vector<64x16xf32>
    %cst_12 = arith.constant dense<0.000000e+00> : vector<8x16xf32>
    %14 = tpu.matmul %12, %13, %cst_12 {dimension_numbers = #tpu.dot_dimension_numbers<[1], [0], [0], [1], [0, 0, 1, 1], [], []>} : vector<8x64xf32>, vector<64x16xf32>, vector<8x16xf32> -> vector<8x16xf32>
    %c0_13 = arith.constant 0 : index
    %c0_14 = arith.constant 0 : index
    %15 = vector.load %arg7[%c0_13, %c0_14] : memref<1x16xf32, #tpu.memory_space<vmem>>, vector<1x16xf32>
    %16 = vector.broadcast %15 : vector<1x16xf32> to vector<8x16xf32>
    %17 = arith.addf %14, %16 : vector<8x16xf32>
    %18 = math.tanh %17 : vector<8x16xf32>
    %c0_15 = arith.constant 0 : index
    %c0_16 = arith.constant 0 : index
    %19 = vector.load %arg8[%c0_15, %c0_16] : memref<16x128xf32, #tpu.memory_space<vmem>>, vector<16x128xf32>
    %cst_17 = arith.constant dense<0.000000e+00> : vector<8x128xf32>
    %20 = tpu.matmul %18, %19, %cst_17 {dimension_numbers = #tpu.dot_dimension_numbers<[1], [0], [0], [1], [0, 0, 1, 1], [], []>} : vector<8x16xf32>, vector<16x128xf32>, vector<8x128xf32> -> vector<8x128xf32>
    %c0_18 = arith.constant 0 : index
    %c0_19 = arith.constant 0 : index
    %21 = vector.load %arg9[%c0_18, %c0_19] : memref<1x128xf32, #tpu.memory_space<vmem>>, vector<1x128xf32>
    %22 = vector.broadcast %21 : vector<1x128xf32> to vector<8x128xf32>
    %23 = arith.addf %20, %22 : vector<8x128xf32>
    %c0_20 = arith.constant 0 : index
    %c0_21 = arith.constant 0 : index
    %24 = vector.load %arg18[%c0_20, %c0_21] : memref<8x128xf32, #tpu.memory_space<vmem>>, vector<8x128xf32>
    tpu.vector_store %arg18[%c0_20, %c0_21], %23 {strides = array<i32>} : memref<8x128xf32, #tpu.memory_space<vmem>>, vector<8x128xf32>,
    %c0_22 = arith.constant 0 : index
    %c0_23 = arith.constant 0 : index
    %25 = vector.load %arg10[%c0_22, %c0_23] : memref<128x16xf32, #tpu.memory_space<vmem>>, vector<128x16xf32>
    %cst_24 = arith.constant dense<0.000000e+00> : vector<8x16xf32>
    %26 = tpu.matmul %23, %25, %cst_24 {dimension_numbers = #tpu.dot_dimension_numbers<[1], [0], [0], [1], [0, 0, 1, 1], [], []>} : vector<8x128xf32>, vector<128x16xf32>, vector<8x16xf32> -> vector<8x16xf32>
    %c0_25 = arith.constant 0 : index
    %c0_26 = arith.constant 0 : index
    %27 = vector.load %arg11[%c0_25, %c0_26] : memref<1x16xf32, #tpu.memory_space<vmem>>, vector<1x16xf32>
    %28 = vector.broadcast %27 : vector<1x16xf32> to vector<8x16xf32>
    %29 = arith.addf %26, %28 : vector<8x16xf32>
    %30 = math.tanh %29 : vector<8x16xf32>
    %c0_27 = arith.constant 0 : index
    %c0_28 = arith.constant 0 : index
    %31 = vector.load %arg12[%c0_27, %c0_28] : memref<16x64xf32, #tpu.memory_space<vmem>>, vector<16x64xf32>
    %cst_29 = arith.constant dense<0.000000e+00> : vector<8x64xf32>
    %32 = tpu.matmul %30, %31, %cst_29 {dimension_numbers = #tpu.dot_dimension_numbers<[1], [0], [0], [1], [0, 0, 1, 1], [], []>} : vector<8x16xf32>, vector<16x64xf32>, vector<8x64xf32> -> vector<8x64xf32>
    %c0_30 = arith.constant 0 : index
    %c0_31 = arith.constant 0 : index
    %33 = vector.load %arg13[%c0_30, %c0_31] : memref<1x64xf32, #tpu.memory_space<vmem>>, vector<1x64xf32>
    %34 = vector.broadcast %33 : vector<1x64xf32> to vector<8x64xf32>
    %35 = arith.addf %32, %34 : vector<8x64xf32>
    %36 = math.tanh %35 : vector<8x64xf32>
    %c0_32 = arith.constant 0 : index
    %c0_33 = arith.constant 0 : index
    %37 = vector.load %arg14[%c0_32, %c0_33] : memref<64x128xf32, #tpu.memory_space<vmem>>, vector<64x128xf32>
    %cst_34 = arith.constant dense<0.000000e+00> : vector<8x128xf32>
    %38 = tpu.matmul %36, %37, %cst_34 {dimension_numbers = #tpu.dot_dimension_numbers<[1], [0], [0], [1], [0, 0, 1, 1], [], []>} : vector<8x64xf32>, vector<64x128xf32>, vector<8x128xf32> -> vector<8x128xf32>
    %c0_35 = arith.constant 0 : index
    %c0_36 = arith.constant 0 : index
    %39 = vector.load %arg15[%c0_35, %c0_36] : memref<1x128xf32, #tpu.memory_space<vmem>>, vector<1x128xf32>
    %40 = vector.broadcast %39 : vector<1x128xf32> to vector<8x128xf32>
    %41 = arith.addf %38, %40 : vector<8x128xf32>
    %42 = math.tanh %41 : vector<8x128xf32>
    %c0_37 = arith.constant 0 : index
    %c0_38 = arith.constant 0 : index
    %43 = vector.load %arg16[%c0_37, %c0_38] : memref<128x896xf32, #tpu.memory_space<vmem>>, vector<128x896xf32>
    %cst_39 = arith.constant dense<0.000000e+00> : vector<8x896xf32>
    %44 = tpu.matmul %42, %43, %cst_39 {dimension_numbers = #tpu.dot_dimension_numbers<[1], [0], [0], [1], [0, 0, 1, 1], [], []>} : vector<8x128xf32>, vector<128x896xf32>, vector<8x896xf32> -> vector<8x896xf32>
    %c0_40 = arith.constant 0 : index
    %c0_41 = arith.constant 0 : index
    %45 = vector.load %arg17[%c0_40, %c0_41] : memref<1x896xf32, #tpu.memory_space<vmem>>, vector<1x896xf32>
    %46 = vector.broadcast %45 : vector<1x896xf32> to vector<8x896xf32>
    %47 = arith.addf %44, %46 : vector<8x896xf32>
    %48 = arith.negf %47 : vector<8x896xf32>
    %49 = math.exp %48 : vector<8x896xf32>
    %cst_42 = arith.constant 1.000000e+00 : f32
    %50 = vector.broadcast %cst_42 : f32 to vector<8x896xf32>
    %51 = arith.addf %50, %49 : vector<8x896xf32>
    %52 = arith.divf %50, %51 : vector<8x896xf32>
    %c0_43 = arith.constant 0 : index
    %c0_44 = arith.constant 0 : index
    %53 = vector.load %arg19[%c0_43, %c0_44] : memref<8x896xf32, #tpu.memory_space<vmem>>, vector<8x896xf32>
    tpu.vector_store %arg19[%c0_43, %c0_44], %52 {strides = array<i32>} : memref<8x896xf32, #tpu.memory_space<vmem>>, vector<8x896xf32>,
    return
  }
  func.func @transform_0(%arg0: i32) -> (i32, i32) {
    %c0_i32 = arith.constant 0 : i32
    %c0_i32_0 = arith.constant 0 : i32
    return %arg0, %c0_i32 : i32, i32
  }
  func.func @transform_1(%arg0: i32) -> (i32, i32) {
    %c0_i32 = arith.constant 0 : i32
    %c0_i32_0 = arith.constant 0 : i32
    %c0_i32_1 = arith.constant 0 : i32
    return %c0_i32, %c0_i32_0 : i32, i32
  }
  func.func @transform_2(%arg0: i32) -> (i32, i32) {
    %c0_i32 = arith.constant 0 : i32
    %c0_i32_0 = arith.constant 0 : i32
    %c0_i32_1 = arith.constant 0 : i32
    return %c0_i32, %c0_i32_0 : i32, i32
  }
  func.func @transform_3(%arg0: i32) -> (i32, i32) {
    %c0_i32 = arith.constant 0 : i32
    %c0_i32_0 = arith.constant 0 : i32
    %c0_i32_1 = arith.constant 0 : i32
    return %c0_i32, %c0_i32_0 : i32, i32
  }
  func.func @transform_4(%arg0: i32) -> (i32, i32) {
    %c0_i32 = arith.constant 0 : i32
    %c0_i32_0 = arith.constant 0 : i32
    %c0_i32_1 = arith.constant 0 : i32
    return %c0_i32, %c0_i32_0 : i32, i32
  }
  func.func @transform_5(%arg0: i32) -> (i32, i32) {
    %c0_i32 = arith.constant 0 : i32
    %c0_i32_0 = arith.constant 0 : i32
    %c0_i32_1 = arith.constant 0 : i32
    return %c0_i32, %c0_i32_0 : i32, i32
  }
  func.func @transform_6(%arg0: i32) -> (i32, i32) {
    %c0_i32 = arith.constant 0 : i32
    %c0_i32_0 = arith.constant 0 : i32
    %c0_i32_1 = arith.constant 0 : i32
    return %c0_i32, %c0_i32_0 : i32, i32
  }
  func.func @transform_7(%arg0: i32) -> (i32, i32) {
    %c0_i32 = arith.constant 0 : i32
    %c0_i32_0 = arith.constant 0 : i32
    %c0_i32_1 = arith.constant 0 : i32
    return %c0_i32, %c0_i32_0 : i32, i32
  }
  func.func @transform_8(%arg0: i32) -> (i32, i32) {
    %c0_i32 = arith.constant 0 : i32
    %c0_i32_0 = arith.constant 0 : i32
    %c0_i32_1 = arith.constant 0 : i32
    return %c0_i32, %c0_i32_0 : i32, i32
  }
  func.func @transform_9(%arg0: i32) -> (i32, i32) {
    %c0_i32 = arith.constant 0 : i32
    %c0_i32_0 = arith.constant 0 : i32
    %c0_i32_1 = arith.constant 0 : i32
    return %c0_i32, %c0_i32_0 : i32, i32
  }
  func.func @transform_10(%arg0: i32) -> (i32, i32) {
    %c0_i32 = arith.constant 0 : i32
    %c0_i32_0 = arith.constant 0 : i32
    %c0_i32_1 = arith.constant 0 : i32
    return %c0_i32, %c0_i32_0 : i32, i32
  }
  func.func @transform_11(%arg0: i32) -> (i32, i32) {
    %c0_i32 = arith.constant 0 : i32
    %c0_i32_0 = arith.constant 0 : i32
    %c0_i32_1 = arith.constant 0 : i32
    return %c0_i32, %c0_i32_0 : i32, i32
  }
  func.func @transform_12(%arg0: i32) -> (i32, i32) {
    %c0_i32 = arith.constant 0 : i32
    %c0_i32_0 = arith.constant 0 : i32
    %c0_i32_1 = arith.constant 0 : i32
    return %c0_i32, %c0_i32_0 : i32, i32
  }
  func.func @transform_13(%arg0: i32) -> (i32, i32) {
    %c0_i32 = arith.constant 0 : i32
    %c0_i32_0 = arith.constant 0 : i32
    %c0_i32_1 = arith.constant 0 : i32
    return %c0_i32, %c0_i32_0 : i32, i32
  }
  func.func @transform_14(%arg0: i32) -> (i32, i32) {
    %c0_i32 = arith.constant 0 : i32
    %c0_i32_0 = arith.constant 0 : i32
    %c0_i32_1 = arith.constant 0 : i32
    return %c0_i32, %c0_i32_0 : i32, i32
  }
  func.func @transform_15(%arg0: i32) -> (i32, i32) {
    %c0_i32 = arith.constant 0 : i32
    %c0_i32_0 = arith.constant 0 : i32
    %c0_i32_1 = arith.constant 0 : i32
    return %c0_i32, %c0_i32_0 : i32, i32
  }
  func.func @transform_16(%arg0: i32) -> (i32, i32) {
    %c0_i32 = arith.constant 0 : i32
    %c0_i32_0 = arith.constant 0 : i32
    %c0_i32_1 = arith.constant 0 : i32
    return %c0_i32, %c0_i32_0 : i32, i32
  }
  func.func @transform_17(%arg0: i32) -> (i32, i32) {
    %c0_i32 = arith.constant 0 : i32
    %c0_i32_0 = arith.constant 0 : i32
    return %arg0, %c0_i32 : i32, i32
  }
  func.func @transform_18(%arg0: i32) -> (i32, i32) {
    %c0_i32 = arith.constant 0 : i32
    %c0_i32_0 = arith.constant 0 : i32
    return %arg0, %c0_i32 : i32, i32
  }
}

</mosaic_0001>

<bundles_post_ra>
// kernel: _autoencoder_forward_impl.1
= control target key start
LH: loop header
LB: loop body
LE: loop exit
PB: predicated region body
PF: predicated region fallthrough
CT: control target
= control target key end

     0   :  { %s4149_s0 = inlined_call_operand.vmem [shape: f32[16,896], index: 0, kind: input, shape index: {}]   ;;  %s4150_s1 = inlined_call_operand.vmem [shape: f32[896,128], index: 1, kind: input, shape index: {}]   ;;  %s4151_s2 = inlined_call_operand.vmem [shape: f32[1,128], index: 2, kind: input, shape index: {}]   ;;  %s4152_s3 = inlined_call_operand.vmem [shape: f32[128,64], index: 3, kind: input, shape index: {}]   ;;  %s4153_s4 = inlined_call_operand.vmem [shape: f32[1,64], index: 4, kind: input, shape index: {}]   ;;  %s4154_s5 = inlined_call_operand.vmem [shape: f32[64,16], index: 5, kind: input, shape index: {}]   ;;  %s4155_s6 = inlined_call_operand.vmem [shape: f32[1,16], index: 6, kind: input, shape index: {}]   ;;  %s4156_s7 = inlined_call_operand.vmem [shape: f32[16,128], index: 7, kind: input, shape index: {}]   ;;  %s4157_s8 = inlined_call_operand.vmem [shape: f32[1,128], index: 8, kind: input, shape index: {}]   ;;  %s4158_s9 = inlined_call_operand.vmem [shape: f32[128,16], index: 9, kind: input, shape index: {}]   ;;  %s4159_s10 = inlined_call_operand.vmem [shape: f32[1,16], index: 10, kind: input, shape index: {}]   ;;  %s4160_s11 = inlined_call_operand.vmem [shape: f32[16,64], index: 11, kind: input, shape index: {}]   ;;  %s4161_s12 = inlined_call_operand.vmem [shape: f32[1,64], index: 12, kind: input, shape index: {}]   ;;  %s4162_s13 = inlined_call_operand.vmem [shape: f32[64,128], index: 13, kind: input, shape index: {}]   ;;  %s4163_s14 = inlined_call_operand.vmem [shape: f32[1,128], index: 14, kind: input, shape index: {}]   ;;  %s4164_s15 = inlined_call_operand.vmem [shape: f32[128,896], index: 15, kind: input, shape index: {}]   ;;  %s4165_s16 = inlined_call_operand.vmem [shape: f32[1,896], index: 16, kind: input, shape index: {}]   ;;  %s4166_s17 = inlined_call_operand.vmem [shape: f32[16,128], index: 17, kind: output, shape index: {0}]   ;;  %s4167_s18 = inlined_call_operand.hbm [shape: f32[16,896], index: 18, kind: output, shape index: {1}]  }
   0x1   :  { %4179 = sst [smem:[#allocation13_spill]] %s4149_s0 }
   0x2   :  { %4180 = sst [smem:[#allocation14_spill]] %s4150_s1 }
   0x3   :  { %4181 = sst [smem:[#allocation15_spill]] %s4151_s2 }
   0x4   :  { %4182 = sst [smem:[#allocation16_spill]] %s4167_s18 }
   0x5   :  { %24 = vsyncpa [#allocation3], 0 }
   0x6   :  { %26 = vsyncpa [#allocation3 + $0x1], 0  ;;  %s3094_s27 = smov 0   ;;  %s3096_s28 = smov 0  }
   0x7   :  { %s3098_s29 = smov 0   ;;  %s3100_s30 = smov 0  }
   0x8 LB: > { %4183 = sst [smem:[#allocation5_spill]] %s2981_s27  ;;  %s3115_s0 = sadd.s32 4294967295, %s2993_s30   ;;  %s2993_s30 = sphi %s3100_s30, %s4202_s30   ;;  %s2989_s29 = sphi %s3098_s29, %s4204_s29   ;;  %s2985_s28 = sphi %s3096_s28, %s4206_s28   ;;  %s2981_s27 = sphi %s3094_s27, %s4205_s27  }
   0x9   : > { %4184 = sst [smem:[#allocation6_spill]] %s2989_s29  ;;  %s2112_s19 = sadd.s32 4294967294, %s2993_s30  }
   0xa   : > { %4185 = sst [smem:[#allocation7_spill]] %s2993_s30  ;;  %s3119_s1 = sadd.s32 1, %s2993_s30  }
   0xb   : > { %4186 = sst [smem:[#allocation8_spill]] %s3115_s0  ;;  %s427_s20 = sadd.s32 1, %s2989_s29 }
   0xc   : > { %4187 = sst [smem:[#allocation9_spill]] %s3119_s1  ;;  %s424_s21 = ssub.s32 %s2993_s30, %s3119_s1 }
   0xd   : > { %p437_p0 = scmp.ne.s32.totalorder %s2989_s29, %s2985_s28  ;;  %p425_p1 = scmp.eq.s32.totalorder %s424_s21, 0 }
   0xe   : > { %p438_p2 = scmp.eq.s32.totalorder %s3115_s0, 1  ;;  %p443_p3 = scmp.ne.s32.totalorder %s2985_s28, %s2981_s27 }
   0xf   : > { %p444_p4 = scmp.eq.s32.totalorder %s2112_s19, 1  ;;  %p2115_p7 = scmp.ge.s32.totalorder %s2993_s30, 1 }
  0x10   : > { %s3130_s22 = scalar_select %p425_p1, %s2989_s29, %s427_s20  }
  0x11   : > { %p3132_p5 = por %p438_p2, %p437_p0  ;;  %p3136_p6 = por %p444_p4, %p443_p3 }
  0x12   : > { %4188 = sst [smem:[#allocation10_spill]] %s3130_s22  ;;  %p518_p8 = scmp.lt.s32.totalorder %s2993_s30, 3 }
  0x13   : > { %s4189_s2 = scalar_select %p3132_p5, 1, 0 }
  0x14   : > { %s4191_s23 = scalar_select %p3136_p6, 1, 0 }
  0x15   : > { %4190 = sst [smem:[#allocation11_spill]] %s4189_s2  ;;  %p519_p9 = pnand %p2115_p7, %p518_p8 }
  0x16   : > { %4192 = sst [smem:[#allocation12_spill]] %s4191_s23  ;;  %s4193_s26 = sld [smem:[#allocation14_spill]] (!%p519_p9)  ;;  %vm2996_vm0 = vmmov (!%p519_p9), 0   ;;  %vm1101_vm1 = vcmask (!%p519_p9), 523264   ;;  %vm1185_vm2 = vcmask (!%p519_p9), 130048  }
  0x17   : > { %522 = sbr.rel (%p519_p9) target bundleno = 1952 (0x7a0), region = 88  ;;  %p576_p10 = scmp.lt.s32.totalorder (!%p519_p9), %s3115_s0, 1 }
  0x18   : > { %s4194_s25 = sld [smem:[#allocation13_spill]] (!%p519_p9)  ;;  %s4195_s20 = sld [smem:[#allocation15_spill]] (!%p519_p9) }
  0x19   : > { %s573_s19 = sand.u32 (!%p519_p9), 1, %s2985_s28   ;;  %s4196_s27 = sld [smem:[#allocation8_spill]] (!%p519_p9) }
  0x1a   : > { %s2846_s1 = smul.u32 (!%p519_p9), 56, %s573_s19  ;;  %s4198_s2 = sld [smem:[#allocation16_spill]] (!%p519_p9) }
  0x1c   : > { %v608_v0 = vld [vmem:[%s4193_s26 + $0x80] sm:$0xff] (!%p519_p9)  ;;  %v609_v1 = vld [vmem:[%s4193_s26 + $0x88] sm:$0xff] (!%p519_p9)  ;;  %v610_v11 = vld [vmem:[%s4193_s26 + $0x90] sm:$0xff] (!%p519_p9) }
  0x1d   : > { %v592_v2 = vld [vmem:[%s4193_s26] sm:$0xff] (!%p519_p9)  ;;  %v2528_v3 = vpack.c.bf16 (!%p519_p9), %v609_v1, %v608_v0  ;;  %v593_v4 = vld [vmem:[%s4193_s26 + $0x8] sm:$0xff] (!%p519_p9)  ;;  %v611_v13 = vld [vmem:[%s4193_s26 + $0x98] sm:$0xff] (!%p519_p9) }
  0x1e   : > { %v640_v5 = vld [vmem:[%s4193_s26 + $0x180] sm:$0xff]  ;;  %v641_v6 = vld [vmem:[%s4193_s26 + $0x188] sm:$0xff]  ;;  %v2530_v7 = vpack.c.bf16 %v593_v4, %v592_v2  ;;  %v594_v14 = vld [vmem:[%s4193_s26 + $0x10] sm:$0xff]  ;;  %v2532_v16 = vpack.c.bf16 %v611_v13, %v610_v11  ;;  %s3236_s29 = scalar_select %p576_p10, %s3115_s0, 1 }
  0x1f   : > { %v2560_v8 = vpack.c.bf16 %v641_v6, %v640_v5  ;;  %v624_v9 = vld [vmem:[%s4193_s26 + $0x100] sm:$0xff]  ;;  %v625_v10 = vld [vmem:[%s4193_s26 + $0x108] sm:$0xff]  ;;  %2529 = vmatprep.subr.bf16.mxu0 %v2528_v3  ;;  %v595_v15 = vld [vmem:[%s4193_s26 + $0x18] sm:$0xff]  ;;  %s2848_s30 = smul.u32 896, %s4196_s27 }
  0x20   : > { %v2562_v12 = vpack.c.bf16 %v625_v10, %v624_v9  ;;  %2531 = vmatpush3.bf16.msra.mxu0 %v2530_v7  ;;  %v2534_v17 = vpack.c.bf16 %v595_v15, %v594_v14  ;;  %v642_v18 = vld [vmem:[%s4193_s26 + $0x190] sm:$0xff]  ;;  %v643_v19 = vld [vmem:[%s4193_s26 + $0x198] sm:$0xff]  ;;  %v612_v23 = vld [vmem:[%s4193_s26 + $0xa0] sm:$0xff]  ;;  %s2847_s22 = smul.u32 56, %s3236_s29  ;;  %s2117_s0 = sshll.u32 %s3236_s29, 3 }
  0x21   : > { %2561 = vmatprep.subr.bf16.mxu1 %v2560_v8  ;;  %v626_v20 = vld [vmem:[%s4193_s26 + $0x110] sm:$0xff]  ;;  %v2564_v21 = vpack.c.bf16 %v643_v19, %v642_v18  ;;  %v627_v22 = vld [vmem:[%s4193_s26 + $0x118] sm:$0xff]  ;;  %v613_v24 = vld [vmem:[%s4193_s26 + $0xa8] sm:$0xff]  ;;  %2533 = vmatprep.subr.bf16.mxu0 %v2532_v16  ;;  %s584_s18 = scalar_lea.vmem %s4166_s17, %s2117_s0  ;;  %s4091_s29 = scalar_lea.vmem [#allocation2], %s2846_s1 }
  0x22   : > { %2563 = vmatpush3.bf16.msra.mxu1 %v2562_v12  ;;  %v2566_v25 = vpack.c.bf16 %v627_v22, %v626_v20  ;;  %v2536_v26 = vpack.c.bf16 %v613_v24, %v612_v23  ;;  %v596_v27 = vld [vmem:[%s4193_s26 + $0x20] sm:$0xff]  ;;  %v597_v28 = vld [vmem:[%s4193_s26 + $0x28] sm:$0xff]  ;;  %v614_v35 = vld [vmem:[%s4193_s26 + $0xb0] sm:$0xff]  ;;  %s3293_s21 = scalar_lea.vmem %s4194_s25, %s2847_s22  ;;  %s2029_s22 = sshll.u32 %s4091_s29, 4  ;;  %s4105_s22 = int_to_ptr.vmem [resolvable:$true] %s2029_s22 }
  0x23   : > { %v644_v29 = vld [vmem:[%s4193_s26 + $0x1a0] sm:$0xff]  ;;  %2565 = vmatprep.subr.bf16.mxu1 %v2564_v21  ;;  %v645_v30 = vld [vmem:[%s4193_s26 + $0x1a8] sm:$0xff]  ;;  %v2538_v33 = vpack.c.bf16 %v597_v28, %v596_v27  ;;  %v615_v36 = vld [vmem:[%s4193_s26 + $0xb8] sm:$0xff]  ;;  %s4103_s24 = scalar_lea.hbm %s4198_s2, %s2848_s30  ;;  %s2012_s25 = scalar_lea.sflag [#allocation3], %s573_s19 }
  0x24   : > { %v628_v31 = vld [vmem:[%s4193_s26 + $0x120] sm:$0xff]  ;;  %v629_v32 = vld [vmem:[%s4193_s26 + $0x128] sm:$0xff]  ;;  %2535 = vmatpush3.bf16.msra.mxu0 %v2534_v17  ;;  %v2568_v34 = vpack.c.bf16 %v645_v30, %v644_v29  ;;  %v598_v37 = vld [vmem:[%s4193_s26 + $0x30] sm:$0xff]  ;;  %v2540_v39 = vpack.c.bf16 %v615_v36, %v614_v35 }
  0x25   : > { %2537 = vmatprep.subr.bf16.mxu0 %v2536_v26  ;;  %v2570_v38 = vpack.c.bf16 %v629_v32, %v628_v31  ;;  %v599_v40 = vld [vmem:[%s4193_s26 + $0x38] sm:$0xff]  ;;  %v646_v41 = vld [vmem:[%s4193_s26 + $0x1b0] sm:$0xff]  ;;  %v616_v46 = vld [vmem:[%s4193_s26 + $0xc0] sm:$0xff] }
  0x26   : > { %2567 = vmatpush3.bf16.msra.mxu1 %v2566_v25  ;;  %v647_v42 = vld [vmem:[%s4193_s26 + $0x1b8] sm:$0xff]  ;;  %v630_v44 = vld [vmem:[%s4193_s26 + $0x130] sm:$0xff]  ;;  %v617_v47 = vld [vmem:[%s4193_s26 + $0xc8] sm:$0xff]  ;;  %v2542_v48 = vpack.c.bf16 %v599_v40, %v598_v37 }
  0x27   : > { %2569 = vmatprep.subr.bf16.mxu1 %v2568_v34  ;;  %v2572_v43 = vpack.c.bf16 %v647_v42, %v646_v41  ;;  %v631_v45 = vld [vmem:[%s4193_s26 + $0x138] sm:$0xff]  ;;  %v648_v49 = vld [vmem:[%s4193_s26 + $0x1c0] sm:$0xff]  ;;  %v649_v50 = vld [vmem:[%s4193_s26 + $0x1c8] sm:$0xff]  ;;  %v2544_v52 = vpack.c.bf16 %v617_v47, %v616_v46 }
  0x28   : > { %2539 = vmatpush3.bf16.msra.mxu0 %v2538_v33  ;;  %v2574_v51 = vpack.c.bf16 %v631_v45, %v630_v44  ;;  %v600_v53 = vld [vmem:[%s4193_s26 + $0x40] sm:$0xff]  ;;  %v601_v54 = vld [vmem:[%s4193_s26 + $0x48] sm:$0xff]  ;;  %v2576_v56 = vpack.c.bf16 %v649_v50, %v648_v49  ;;  %v618_v58 = vld [vmem:[%s4193_s26 + $0xd0] sm:$0xff] }
  0x29   : > { %2541 = vmatprep.subr.bf16.mxu0 %v2540_v39  ;;  %v632_v55 = vld [vmem:[%s4193_s26 + $0x140] sm:$0xff]  ;;  %v633_v57 = vld [vmem:[%s4193_s26 + $0x148] sm:$0xff]  ;;  %v619_v59 = vld [vmem:[%s4193_s26 + $0xd8] sm:$0xff]  ;;  %v2546_v62 = vpack.c.bf16 %v601_v54, %v600_v53 }
  0x2a   : > { %2571 = vmatpush3.bf16.msra.mxu1 %v2570_v38  ;;  %v650_v60 = vld [vmem:[%s4193_s26 + $0x1d0] sm:$0xff]  ;;  %v651_v61 = vld [vmem:[%s4193_s26 + $0x1d8] sm:$0xff]  ;;  %v2578_v63 = vpack.c.bf16 %v633_v57, %v632_v55  ;;  %v2548_v0 = vpack.c.bf16 %v619_v59, %v618_v58  ;;  %v620_v6 = vld [vmem:[%s4193_s26 + $0xe0] sm:$0xff] }
  0x2b   : > { %2573 = vmatprep.subr.bf16.mxu1 %v2572_v43  ;;  %v602_v1 = vld [vmem:[%s4193_s26 + $0x50] sm:$0xff]  ;;  %v603_v2 = vld [vmem:[%s4193_s26 + $0x58] sm:$0xff]  ;;  %v2580_v4 = vpack.c.bf16 %v651_v61, %v650_v60  ;;  %v621_v7 = vld [vmem:[%s4193_s26 + $0xe8] sm:$0xff] }
  0x2c   : > { %2543 = vmatpush3.bf16.msra.mxu0 %v2542_v48  ;;  %v634_v3 = vld [vmem:[%s4193_s26 + $0x150] sm:$0xff]  ;;  %v635_v5 = vld [vmem:[%s4193_s26 + $0x158] sm:$0xff]  ;;  %v652_v8 = vld [vmem:[%s4193_s26 + $0x1e0] sm:$0xff]  ;;  %v2550_v10 = vpack.c.bf16 %v603_v2, %v602_v1  ;;  %v2552_v14 = vpack.c.bf16 %v621_v7, %v620_v6  ;;  %v2997_v1 = vmov 0.0  }
  0x2d   : > { %2545 = vmatprep.subr.bf16.mxu0 %v2544_v52  ;;  %v653_v9 = vld [vmem:[%s4193_s26 + $0x1e8] sm:$0xff]  ;;  %v604_v11 = vld [vmem:[%s4193_s26 + $0x60] sm:$0xff]  ;;  %v2582_v13 = vpack.c.bf16 %v635_v5, %v634_v3  ;;  %v622_v19 = vld [vmem:[%s4193_s26 + $0xf0] sm:$0xff] }
  0x2e   : > { %2575 = vmatpush3.bf16.msra.mxu1 %v2574_v51  ;;  %v586_v12 = vld [vmem:[%s3293_s21 + $0x8] sm:$0xff]  ;;  %v636_v16 = vld [vmem:[%s4193_s26 + $0x160] sm:$0xff]  ;;  %v2584_v18 = vpack.c.bf16 %v653_v9, %v652_v8  ;;  %v623_v20 = vld [vmem:[%s4193_s26 + $0xf8] sm:$0xff]  ;;  %v2995_v51 = vmov 0.0|0.0  }
  0x2f   : > { %2577 = vmatprep.subr.bf16.mxu1 %v2576_v56  ;;  %v605_v15 = vld [vmem:[%s4193_s26 + $0x68] sm:$0xff]  ;;  %775 = vmatprep.mubr.f32.mxu0 %v586_v12  ;;  %v588_v21 = vld [vmem:[%s3293_s21 + $0x18] sm:$0xff]  ;;  %v654_v22 = vld [vmem:[%s4193_s26 + $0x1f0] sm:$0xff]  ;;  %v2556_v26 = vpack.c.bf16 %v623_v20, %v622_v19 }
  0x30   : > { %2547 = vmatpush3.bf16.msra.mxu0 %v2546_v62  ;;  %v637_v17 = vld [vmem:[%s4193_s26 + $0x168] sm:$0xff]  ;;  %v655_v23 = vld [vmem:[%s4193_s26 + $0x1f8] sm:$0xff]  ;;  %845 = vmatprep.mubr.f32.mxu1 %v588_v21  ;;  %v2554_v24 = vpack.c.bf16 %v605_v15, %v604_v11  ;;  %v606_v27 = vld [vmem:[%s4193_s26 + $0x70] sm:$0xff] }
  0x31   : > { %2549 = vmatprep.subr.bf16.mxu0 %v2548_v0  ;;  %v2586_v25 = vpack.c.bf16 %v637_v17, %v636_v16  ;;  %v607_v28 = vld [vmem:[%s4193_s26 + $0x78] sm:$0xff]  ;;  %v638_v29 = vld [vmem:[%s4193_s26 + $0x170] sm:$0xff]  ;;  %v2588_v30 = vpack.c.bf16 %v655_v23, %v654_v22  ;;  %v672_v32 = vld [vmem:[%s4193_s26 + $0x280] sm:$0xff] }
  0x32   : > { %2579 = vmatpush3.bf16.msra.mxu1 %v2578_v63  ;;  %v639_v31 = vld [vmem:[%s4193_s26 + $0x178] sm:$0xff]  ;;  %v673_v33 = vld [vmem:[%s4193_s26 + $0x288] sm:$0xff]  ;;  %v2558_v34 = vpack.c.bf16 %v607_v28, %v606_v27  ;;  %v656_v37 = vld [vmem:[%s4193_s26 + $0x200] sm:$0xff] }
  0x33   : > { %2581 = vmatprep.subr.bf16.mxu1 %v2580_v4  ;;  %v2590_v35 = vpack.c.bf16 %v639_v31, %v638_v29  ;;  %v2592_v36 = vpack.c.bf16 %v673_v33, %v672_v32  ;;  %v657_v38 = vld [vmem:[%s4193_s26 + $0x208] sm:$0xff]  ;;  %v674_v39 = vld [vmem:[%s4193_s26 + $0x290] sm:$0xff]  ;;  %v675_v40 = vld [vmem:[%s4193_s26 + $0x298] sm:$0xff] }
  0x34   : > { %2551 = vmatpush3.bf16.msra.mxu0 %v2550_v10  ;;  %v688_v41 = vld [vmem:[%s4193_s26 + $0x300] sm:$0xff]  ;;  %v689_v42 = vld [vmem:[%s4193_s26 + $0x308] sm:$0xff]  ;;  %v2594_v44 = vpack.c.bf16 %v657_v38, %v656_v37  ;;  %v587_v45 = vld [vmem:[%s3293_s21 + $0x10] sm:$0xff]  ;;  %v2596_v46 = vpack.c.bf16 %v675_v40, %v674_v39 }
  0x35   : > { %2553 = vmatprep.subr.bf16.mxu0 %v2552_v14  ;;  %v585_v43 = vld [vmem:[%s3293_s21] sm:$0xff]  ;;  %v658_v47 = vld [vmem:[%s4193_s26 + $0x210] sm:$0xff]  ;;  %v659_v48 = vld [vmem:[%s4193_s26 + $0x218] sm:$0xff]  ;;  %v2625_v49 = vpack.c.bf16 %v689_v42, %v688_v41 }
  0x36   : > { %2583 = vmatpush3.bf16.msra.mxu1 %v2582_v13  ;;  %v676_v50 = vld [vmem:[%s4193_s26 + $0x2a0] sm:$0xff]  ;;  %v677_v52 = vld [vmem:[%s4193_s26 + $0x2a8] sm:$0xff]  ;;  %v690_v53 = vld [vmem:[%s4193_s26 + $0x310] sm:$0xff]  ;;  %v2598_v55 = vpack.c.bf16 %v659_v48, %v658_v47 }
  0x37   : > { %2585 = vmatprep.subr.bf16.mxu1 %v2584_v18  ;;  %v691_v54 = vld [vmem:[%s4193_s26 + $0x318] sm:$0xff]  ;;  %v660_v56 = vld [vmem:[%s4193_s26 + $0x220] sm:$0xff]  ;;  %v2600_v57 = vpack.c.bf16 %v677_v52, %v676_v50  ;;  %v661_v58 = vld [vmem:[%s4193_s26 + $0x228] sm:$0xff] }
  0x38   : > { %2555 = vmatpush3.bf16.msra.mxu0 %v2554_v24  ;;  %v2628_v59 = vpack.c.bf16 %v691_v54, %v690_v53  ;;  %v678_v60 = vld [vmem:[%s4193_s26 + $0x2b0] sm:$0xff]  ;;  %v679_v61 = vld [vmem:[%s4193_s26 + $0x2b8] sm:$0xff]  ;;  %v692_v62 = vld [vmem:[%s4193_s26 + $0x320] sm:$0xff]  ;;  %v2602_v2 = vpack.c.bf16 %v661_v58, %v660_v56 }
  0x39   : > { %2557 = vmatprep.subr.bf16.mxu0 %v2556_v26  ;;  %v693_v63 = vld [vmem:[%s4193_s26 + $0x328] sm:$0xff]  ;;  %v2604_v3 = vpack.c.bf16 %v679_v61, %v678_v60  ;;  %v662_v4 = vld [vmem:[%s4193_s26 + $0x230] sm:$0xff]  ;;  %v663_v5 = vld [vmem:[%s4193_s26 + $0x238] sm:$0xff] }
  0x3a   : > { %2587 = vmatpush3.bf16.msra.mxu1 %v2586_v25  ;;  %v590_v0 = vld [vmem:[%s3293_s21 + $0x28] sm:$0xff]  ;;  %v2631_v6 = vpack.c.bf16 %v693_v63, %v692_v62  ;;  %v680_v7 = vld [vmem:[%s4193_s26 + $0x2c0] sm:$0xff]  ;;  %v694_v9 = vld [vmem:[%s4193_s26 + $0x330] sm:$0xff]  ;;  %v2606_v11 = vpack.c.bf16 %v663_v5, %v662_v4 }
  0x3b   : > { %2589 = vmatprep.subr.bf16.mxu1 %v2588_v30  ;;  %v681_v8 = vld [vmem:[%s4193_s26 + $0x2c8] sm:$0xff]  ;;  %v695_v10 = vld [vmem:[%s4193_s26 + $0x338] sm:$0xff]  ;;  %v664_v13 = vld [vmem:[%s4193_s26 + $0x240] sm:$0xff] }
  0x3c   : > { %2559 = vmatpush3.bf16.msra.mxu0 %v2558_v34  ;;  %v2608_v12 = vpack.c.bf16 %v681_v8, %v680_v7  ;;  %v665_v14 = vld [vmem:[%s4193_s26 + $0x248] sm:$0xff]  ;;  %v2634_v15 = vpack.c.bf16 %v695_v10, %v694_v9  ;;  %v682_v16 = vld [vmem:[%s4193_s26 + $0x2d0] sm:$0xff]  ;;  %v683_v17 = vld [vmem:[%s4193_s26 + $0x2d8] sm:$0xff] }
  0x3d   : > { %2593 = vmatprep.subr.bf16.mxu0 %v2592_v36  ;;  %v696_v18 = vld [vmem:[%s4193_s26 + $0x340] sm:$0xff]  ;;  %v697_v19 = vld [vmem:[%s4193_s26 + $0x348] sm:$0xff]  ;;  %v2610_v20 = vpack.c.bf16 %v665_v14, %v664_v13  ;;  %v2612_v21 = vpack.c.bf16 %v683_v17, %v682_v16  ;;  %v666_v22 = vld [vmem:[%s4193_s26 + $0x250] sm:$0xff] }
  0x3e   : > { %2591 = vmatpush3.bf16.msra.mxu1 %v2590_v35  ;;  %v667_v23 = vld [vmem:[%s4193_s26 + $0x258] sm:$0xff]  ;;  %v2637_v24 = vpack.c.bf16 %v697_v19, %v696_v18  ;;  %v684_v25 = vld [vmem:[%s4193_s26 + $0x2e0] sm:$0xff]  ;;  %v685_v26 = vld [vmem:[%s4193_s26 + $0x2e8] sm:$0xff] }
  0x3f   : > { %2624 = vmatprep.subr.bf16.mxu1 %v2995_v51  ;;  %776 = vmatmul.mubr.f32.vlgmr.msra.gmra.mrb[0].mxu0 %v585_v43  ;;  %v698_v27 = vld [vmem:[%s4193_s26 + $0x350] sm:$0xff]  ;;  %v699_v28 = vld [vmem:[%s4193_s26 + $0x358] sm:$0xff]  ;;  %v2614_v29 = vpack.c.bf16 %v667_v23, %v666_v22  ;;  %v2616_v30 = vpack.c.bf16 %v685_v26, %v684_v25  ;;  %v668_v31 = vld [vmem:[%s4193_s26 + $0x260] sm:$0xff] }
  0x40   : > { %2595 = vmatpush3.bf16.msra.mxu0 %v2594_v44  ;;  %915 = vmatprep.mubr.f32.mxu0 %v590_v0  ;;  %v669_v32 = vld [vmem:[%s4193_s26 + $0x268] sm:$0xff]  ;;  %v2640_v33 = vpack.c.bf16 %v699_v28, %v698_v27  ;;  %v686_v34 = vld [vmem:[%s4193_s26 + $0x2f0] sm:$0xff]  ;;  %v687_v35 = vld [vmem:[%s4193_s26 + $0x2f8] sm:$0xff] }
  0x41   : > { %846 = vmatmul.mubr.f32.vlgmr.msra.gmra.mrb[0].mxu1 %v587_v45  ;;  %2597 = vmatprep.subr.bf16.mxu0 %v2596_v46  ;;  %v700_v36 = vld [vmem:[%s4193_s26 + $0x360] sm:$0xff]  ;;  %v701_v37 = vld [vmem:[%s4193_s26 + $0x368] sm:$0xff]  ;;  %v2618_v38 = vpack.c.bf16 %v669_v32, %v668_v31  ;;  %v2620_v39 = vpack.c.bf16 %v687_v35, %v686_v34  ;;  %v670_v40 = vld [vmem:[%s4193_s26 + $0x270] sm:$0xff] }
  0x42   : > { %2626 = vmatpush3.bf16.msra.mxu1 %v2625_v49  ;;  %2368 = vmatprep.mubr.msk.f32.mxu1 %vm2996_vm0, %v2997_v1  ;;  %v671_v41 = vld [vmem:[%s4193_s26 + $0x278] sm:$0xff]  ;;  %v2643_v42 = vpack.c.bf16 %v701_v37, %v700_v36  ;;  %v702_v43 = vld [vmem:[%s4193_s26 + $0x370] sm:$0xff]  ;;  %v589_v47 = vld [vmem:[%s3293_s21 + $0x20] sm:$0xff] }
  0x43   : > { %2627 = vmatprep.subr.bf16.mxu1 %v2995_v51  ;;  %v703_v44 = vld [vmem:[%s4193_s26 + $0x378] sm:$0xff]  ;;  %v2622_v45 = vpack.c.bf16 %v671_v41, %v670_v40  ;;  %v591_v48 = vld [vmem:[%s3293_s21 + $0x30] sm:$0xff]  ;;  %v992_v49 = vld [vmem:[%s4152_s3] sm:$0xff]  ;;  %s2931_s21 = scalar_lea.vmem %s4105_s22, 896 }
  0x44   : > { %2599 = vmatpush3.bf16.msra.mxu0 %v2598_v55  ;;  %v2646_v46 = vpack.c.bf16 %v703_v44, %v702_v43  ;;  %v993_v50 = vld [vmem:[%s4152_s3 + $0x8] sm:$0xff]  ;;  %v994_v52 = vld [vmem:[%s4152_s3 + $0x10] sm:$0xff]  ;;  %v995_v54 = vld [vmem:[%s4152_s3 + $0x18] sm:$0xff]  ;;  %p2932_p11 = scmp.ne.s32.totalorder %s4105_s22, %s2931_s21 }
  0x45   : > { %2601 = vmatprep.subr.bf16.mxu0 %v2600_v57  ;;  %v2649_v53 = vpack.c.bf16 %v993_v50, %v992_v49  ;;  %v2652_v55 = vpack.c.bf16 %v995_v54, %v994_v52  ;;  %v996_v56 = vld [vmem:[%s4152_s3 + $0x20] sm:$0xff]  ;;  %v997_v57 = vld [vmem:[%s4152_s3 + $0x28] sm:$0xff]  ;;  %v999_v60 = vld [vmem:[%s4152_s3 + $0x38] sm:$0xff] }
  0x46   : > { %2629 = vmatpush3.bf16.msra.mxu1 %v2628_v59  ;;  %v2655_v58 = vpack.c.bf16 %v997_v57, %v996_v56  ;;  %v998_v59 = vld [vmem:[%s4152_s3 + $0x30] sm:$0xff]  ;;  %v1000_v62 = vld [vmem:[%s4152_s3 + $0x40] sm:$0xff]  ;;  %v1001_v63 = vld [vmem:[%s4152_s3 + $0x48] sm:$0xff]  ;;  %p2933_p12 = pnand %p2932_p11, %p3132_p5 }
  0x47   : > { %2630 = vmatprep.subr.bf16.mxu1 %v2995_v51  ;;  %v2658_v61 = vpack.c.bf16 %v999_v60, %v998_v59  ;;  %v2661_v0 = vpack.c.bf16 %v1001_v63, %v1000_v62  ;;  %v1004_v5 = vld [vmem:[%s4152_s3 + $0x60] sm:$0xff]  ;;  %v1006_v8 = vld [vmem:[%s4152_s3 + $0x70] sm:$0xff]  ;;  %v1007_v9 = vld [vmem:[%s4152_s3 + $0x78] sm:$0xff] }
  0x48   : > { %2603 = vmatpush3.bf16.msra.mxu0 %v2602_v2  ;;  %v1002_v2 = vld [vmem:[%s4152_s3 + $0x50] sm:$0xff]  ;;  %v2670_v10 = vpack.c.bf16 %v1007_v9, %v1006_v8  ;;  %v1089_v32 = vld [vmem:[%s4154_s5 + $0x18] sm:$0xff]  ;;  %v1090_v34 = vld [vmem:[%s4154_s5 + $0x20] sm:$0xff]  ;;  %p2934_p13 = pneg %p2933_p12 }
  0x49   : > { %2605 = vmatprep.subr.bf16.mxu0 %v2604_v3  ;;  %v1003_v3 = vld [vmem:[%s4152_s3 + $0x58] sm:$0xff]  ;;  %v1088_v31 = vld [vmem:[%s4154_s5 + $0x10] sm:$0xff]  ;;  %v1091_v35 = vld [vmem:[%s4154_s5 + $0x28] sm:$0xff] }
  0x4a   : > { %2632 = vmatpush3.bf16.msra.mxu1 %v2631_v6  ;;  %v2664_v4 = vpack.c.bf16 %v1003_v3, %v1002_v2  ;;  %v1005_v6 = vld [vmem:[%s4152_s3 + $0x68] sm:$0xff]  ;;  %v2679_v36 = vpack.c.bf16 %v1091_v35, %v1090_v34  ;;  %v1092_v37 = vld [vmem:[%s4154_s5 + $0x30] sm:$0xff]  ;;  %v2119_v40 = vld [vmem:[%s4153_s4] ss:$0 sm:$0xff] }
  0x4b   : > { %2633 = vmatprep.subr.bf16.mxu1 %v2995_v51  ;;  %v2667_v7 = vpack.c.bf16 %v1005_v6, %v1004_v5  ;;  %v1261_v54 = vld [vmem:[%s4158_s9 + $0x8] sm:$0xff]  ;;  %v1262_v56 = vld [vmem:[%s4158_s9 + $0x10] sm:$0xff]  ;;  %v1263_v57 = vld [vmem:[%s4158_s9 + $0x18] sm:$0xff] }
  0x4c   : > { %2607 = vmatpush3.bf16.msra.mxu0 %v2606_v11  ;;  %v1086_v11 = vld [vmem:[%s4154_s5] sm:$0xff]  ;;  %v2691_v59 = vpack.c.bf16 %v1263_v57, %v1262_v56  ;;  %v1266_v63 = vld [vmem:[%s4158_s9 + $0x30] sm:$0xff]  ;;  %v1442_v34 = vld [vmem:[%s4162_s13 + $0x28] sm:$0xff] }
  0x4d   : > { %2609 = vmatprep.subr.bf16.mxu0 %v2608_v12  ;;  %v1087_v12 = vld [vmem:[%s4154_s5 + $0x8] sm:$0xff]  ;;  %v1264_v60 = vld [vmem:[%s4158_s9 + $0x20] sm:$0xff]  ;;  %v1270_v6 = vld [vmem:[%s4158_s9 + $0x50] sm:$0xff] }
  0x4e   : > { %2635 = vmatpush3.bf16.msra.mxu1 %v2634_v15  ;;  %v2673_v13 = vpack.c.bf16 %v1087_v12, %v1086_v11  ;;  %v2118_v15 = vld [vmem:[%s4195_s20] ss:$0 sm:$0xff]  ;;  %v1274_v12 = vld [vmem:[%s4158_s9 + $0x70] sm:$0xff] }
  0x4f   : > { %2636 = vmatprep.subr.bf16.mxu1 %v2995_v51  ;;  %v1268_v3 = vld [vmem:[%s4158_s9 + $0x40] sm:$0xff]  ;;  %v1564_v56 = vld [vmem:[%s4164_s15 + $0x130] sm:$0xff] }
  0x50   : > { %2611 = vmatpush3.bf16.msra.mxu0 %v2610_v20  ;;  %v1272_v9 = vld [vmem:[%s4158_s9 + $0x60] sm:$0xff] }
  0x51   : > { %2613 = vmatprep.subr.bf16.mxu0 %v2612_v21 }
  0x52   : > { %2638 = vmatpush3.bf16.msra.mxu1 %v2637_v24 }
  0x53   : > { %2639 = vmatprep.subr.bf16.mxu1 %v2995_v51 }
  0x54   : > { %2615 = vmatpush3.bf16.msra.mxu0 %v2614_v29 }
  0x55   : > { %2617 = vmatprep.subr.bf16.mxu0 %v2616_v30 }
  0x56   : > { %2641 = vmatpush3.bf16.msra.mxu1 %v2640_v33  ;;  %v2676_v33 = vpack.c.bf16 %v1089_v32, %v1088_v31  ;;  %v1440_v31 = vld [vmem:[%s4162_s13 + $0x18] sm:$0xff] }
  0x57   : > { %2642 = vmatprep.subr.bf16.mxu1 %v2995_v51 }
  0x58   : > { %2619 = vmatpush3.bf16.msra.mxu0 %v2618_v38  ;;  %v1093_v38 = vld [vmem:[%s4154_s5 + $0x38] sm:$0xff] }
  0x59   : > { %2621 = vmatprep.subr.bf16.mxu0 %v2620_v39  ;;  %v2682_v39 = vpack.c.bf16 %v1093_v38, %v1092_v37  ;;  %v1444_v37 = vld [vmem:[%s4162_s13 + $0x38] sm:$0xff] }
  0x5a   : > { %2644 = vmatpush3.bf16.msra.mxu1 %v2643_v42 }
  0x5b   : > { %2645 = vmatprep.subr.bf16.mxu1 %v2995_v51 }
  0x5c   : > { %2623 = vmatpush3.bf16.msra.mxu0 %v2622_v45  ;;  %v1176_v45 = vld [vmem:[%s4156_s7] sm:$0xff] }
  0x5d   : > { %2648 = vmatprep.subr.bf16.mxu0 %v2995_v51 }
  0x5e   : > { %2647 = vmatpush3.bf16.msra.mxu1 %v2646_v46  ;;  %v1177_v46 = vld [vmem:[%s4156_s7 + $0x8] sm:$0xff] }
  0x5f   : > { %2672 = vmatprep.subr.bf16.mxu1 %v2995_v51  ;;  %916 = vmatmul.mubr.f32.vlgmr.msra.gmra.mrb[2].mxu0 %v589_v47  ;;  %v2685_v47 = vpack.c.bf16 %v1177_v46, %v1176_v45  ;;  %v1528_v45 = vld [vmem:[%s4164_s15 + $0x10] sm:$0xff]  ;;  %v1535_v46 = vld [vmem:[%s4164_s15 + $0x48] sm:$0xff] }
  0x60   : > { %2403 = vmatprep.mubr.msk.f32.mxu0 %vm2996_vm0, %v2997_v1  ;;  %2650 = vmatpush3.bf16.msra.mxu0 %v2649_v53  ;;  %v1260_v53 = vld [vmem:[%s4158_s9] sm:$0xff] }
  0x61   : > { %2369 = vmatmul.mubr.f32.vlgmr.msra.gmra.mrb[2].mxu1 %v591_v48  ;;  %2651 = vmatprep.subr.bf16.mxu0 %v2995_v51  ;;  %v2120_v48 = vld [vmem:[%s4155_s6] ss:$0 sm:$0xff] }
  0x62   : > { %2422 = vmatprep.mubr.msk.f32.mxu1 %vm2996_vm0, %v2997_v1  ;;  %2674 = vmatpush3.bf16.msra.mxu1 %v2673_v13  ;;  %v1275_v13 = vld [vmem:[%s4158_s9 + $0x78] sm:$0xff] }
  0x63   : > { %2675 = vmatprep.subr.bf16.mxu1 %v2995_v51 }
  0x64   : > { %2653 = vmatpush3.bf16.msra.mxu0 %v2652_v55  ;;  %v2688_v55 = vpack.c.bf16 %v1261_v54, %v1260_v53  ;;  %v1549_v53 = vld [vmem:[%s4164_s15 + $0xb8] sm:$0xff] }
  0x65   : > { %2654 = vmatprep.subr.bf16.mxu0 %v2995_v51 }
  0x66   : > { %2677 = vmatpush3.bf16.msra.mxu1 %v2676_v33  ;;  %v1441_v33 = vld [vmem:[%s4162_s13 + $0x20] sm:$0xff] }
  0x67   : > { %2678 = vmatprep.subr.bf16.mxu1 %v2995_v51  ;;  %v2721_v35 = vpack.c.bf16 %v1442_v34, %v1441_v33  ;;  %v1568_v33 = vld [vmem:[%s4164_s15 + $0x150] sm:$0xff]  ;;  %v1575_v34 = vld [vmem:[%s4164_s15 + $0x188] sm:$0xff] }
  0x68   : > { %2656 = vmatpush3.bf16.msra.mxu0 %v2655_v58 }
  0x69   : > { %2657 = vmatprep.subr.bf16.mxu0 %v2995_v51 }
  0x6a   : > { %2680 = vmatpush3.bf16.msra.mxu1 %v2679_v36  ;;  %v1443_v36 = vld [vmem:[%s4162_s13 + $0x30] sm:$0xff] }
  0x6b   : > { %2681 = vmatprep.subr.bf16.mxu1 %v2995_v51  ;;  %v2724_v38 = vpack.c.bf16 %v1444_v37, %v1443_v36  ;;  %v1590_v36 = vld [vmem:[%s4164_s15 + $0x200] sm:$0xff]  ;;  %v2740_v37 = vpack.c.bf16 %v1575_v34, %v1568_v33  ;;  %v1551_v33 = vld [vmem:[%s4164_s15 + $0xc8] sm:$0xff] }
  0x6c   : > { %2659 = vmatpush3.bf16.msra.mxu0 %v2658_v61  ;;  %v1265_v61 = vld [vmem:[%s4158_s9 + $0x28] sm:$0xff]  ;;  %v1546_v34 = vld [vmem:[%s4164_s15 + $0xa0] sm:$0xff] }
  0x6d   : > { %2660 = vmatprep.subr.bf16.mxu0 %v2995_v51  ;;  %v2694_v62 = vpack.c.bf16 %v1265_v61, %v1264_v60  ;;  %v1571_v61 = vld [vmem:[%s4164_s15 + $0x168] sm:$0xff] }
  0x6e   : > { %2683 = vmatpush3.bf16.msra.mxu1 %v2682_v39  ;;  %v1527_v39 = vld [vmem:[%s4164_s15 + $0x8] sm:$0xff] }
  0x6f   : > { %2684 = vmatprep.subr.bf16.mxu1 %v2995_v51 }
  0x70   : > { %2662 = vmatpush3.bf16.msra.mxu0 %v2661_v0  ;;  %v1267_v0 = vld [vmem:[%s4158_s9 + $0x38] sm:$0xff] }
  0x71   : > { %2663 = vmatprep.subr.bf16.mxu0 %v2995_v51  ;;  %v2697_v2 = vpack.c.bf16 %v1267_v0, %v1266_v63  ;;  %v1570_v0 = vld [vmem:[%s4164_s15 + $0x160] sm:$0xff] }
  0x74   : > { %2665 = vmatpush3.bf16.msra.mxu0 %v2664_v4  ;;  %v1269_v4 = vld [vmem:[%s4158_s9 + $0x48] sm:$0xff] }
  0x75   : > { %2666 = vmatprep.subr.bf16.mxu0 %v2995_v51  ;;  %v2700_v5 = vpack.c.bf16 %v1269_v4, %v1268_v3  ;;  %v1585_v4 = vld [vmem:[%s4164_s15 + $0x1d8] sm:$0xff] }
  0x78   : > { %2668 = vmatpush3.bf16.msra.mxu0 %v2667_v7  ;;  %v1271_v7 = vld [vmem:[%s4158_s9 + $0x58] sm:$0xff] }
  0x79   : > { %2669 = vmatprep.subr.bf16.mxu0 %v2995_v51  ;;  %v2703_v8 = vpack.c.bf16 %v1271_v7, %v1270_v6  ;;  %v1584_v7 = vld [vmem:[%s4164_s15 + $0x1d0] sm:$0xff] }
  0x7c   : > { %2671 = vmatpush3.bf16.msra.mxu0 %v2670_v10  ;;  %v1273_v10 = vld [vmem:[%s4158_s9 + $0x68] sm:$0xff] }
  0x7d   : > { %2711 = vmatprep.subr.bf16.mxu0 %v2995_v51  ;;  %v2706_v11 = vpack.c.bf16 %v1273_v10, %v1272_v9  ;;  %v2125_v10 = vld [vmem:[%s4161_s12] ss:$0 sm:$0xff] }
 0x112   : > { %v2171_v14 = vpop.f32.mrb[0].mxu0 }
 0x113   : > { %v2172_v16 = vpop.f32.mrb[1].mxu0 }
 0x114   : > { %v2206_v17 = vpop.f32.mrb[0].mxu1  ;;  %v2173_v18 = vadd.f32 %v2172_v16, %v2171_v14  ;;  %v2709_v14 = vpack.c.bf16 %v1275_v13, %v1274_v12 }
 0x115   : > { %v2207_v19 = vpop.f32.mrb[1].mxu1 }
 0x116   : > { %v2208_v20 = vadd.f32 %v2207_v19, %v2206_v17  ;;  %v778_v21 = vadd.f32 %v2173_v18, %v2118_v15  ;;  %v2122_v15 = vld [vmem:[%s4157_s8] ss:$0 sm:$0xff] }
 0x117   : > { %v1354_v19 = vld [vmem:[%s4160_s11] sm:$0xff] }
 0x118   : > { %v848_v22 = vadd.f32 %v2208_v20, %v778_v21  ;;  %v1355_v20 = vld [vmem:[%s4160_s11 + $0x8] sm:$0xff] }
 0x119   : > { %v2712_v21 = vpack.c.bf16 %v1355_v20, %v1354_v19  ;;  %v1540_v20 = vld [vmem:[%s4164_s15 + $0x70] sm:$0xff] }
 0x132   : > { %v2241_v23 = vpop.f32.mrb[2].mxu0 }
 0x133   : > { %v2242_v24 = vpop.f32.mrb[3].mxu0 }
 0x134   : > { %v987_v25 = vpop.f32.mrb[2].mxu1  ;;  %v2243_v26 = vadd.f32 %v2242_v24, %v2241_v23 }
 0x135   : > { %v2370_v27 = vpop.f32.mrb[3].mxu1 }
 0x136   : > { %v918_v28 = vadd.f32 %v2243_v26, %v848_v22  ;;  %v2124_v22 = vld [vmem:[%s4159_s10] ss:$0 sm:$0xff]  ;;  %v1438_v27 = vld [vmem:[%s4162_s13 + $0x8] sm:$0xff] }
 0x137   : > { %v1437_v26 = vld [vmem:[%s4162_s13] sm:$0xff] }
 0x138   : > { %v988_v29 = vadd.f32 %v987_v25, %v918_v28  ;;  %v2715_v28 = vpack.c.bf16 %v1438_v27, %v1437_v26  ;;  %v1554_v27 = vld [vmem:[%s4164_s15 + $0xe0] sm:$0xff] }
 0x13a   : > { %2891 = vtanh.f32 %v988_v29 }
 0x144   : > { %v2892_v30 = vpop.eup %2891 }
 0x145   : > { %2404 = vmatmul.mubr.f32.vlgmr.msra.gmra.mrb[4].mxu0 %v2892_v30  ;;  %v1439_v30 = vld [vmem:[%s4162_s13 + $0x10] sm:$0xff] }
 0x146   : > { %2471 = vmatprep.mubr.msk.f32.mxu0 %vm2996_vm0, %v2997_v1  ;;  %2713 = vmatpush3.bf16.msra.mxu0 %v2712_v21  ;;  %v2718_v32 = vpack.c.bf16 %v1440_v31, %v1439_v30  ;;  %v1547_v21 = vld [vmem:[%s4164_s15 + $0xa8] sm:$0xff]  ;;  %v1576_v30 = vld [vmem:[%s4164_s15 + $0x190] sm:$0xff] }
 0x147   : > { %2714 = vmatprep.subr.bf16.mxu0 %v2995_v51 }
 0x218   : > { %v1081_v41 = vpop.f32.mrb[4].mxu0 }
 0x219   : > { %v1082_v42 = vadd.f32 %v2119_v40, %v1081_v41  ;;  %v2405_v43 = vpop.f32.mrb[5].mxu0  ;;  %v1534_v40 = vld [vmem:[%s4164_s15 + $0x40] sm:$0xff]  ;;  %v1529_v41 = vld [vmem:[%s4164_s15 + $0x18] sm:$0xff] }
 0x21a   : > { %v1536_v43 = vld [vmem:[%s4164_s15 + $0x50] sm:$0xff] }
 0x21b   : > { %2893 = vtanh.f32 %v1082_v42  ;;  %v2726_v42 = vpack.c.bf16 %v1534_v40, %v1527_v39  ;;  %v1582_v39 = vld [vmem:[%s4164_s15 + $0x1c0] sm:$0xff]  ;;  %v1589_v40 = vld [vmem:[%s4164_s15 + $0x1f8] sm:$0xff] }
 0x225   : > { %v2894_v44 = vpop.eup %2893 }
 0x226   : > { %2423 = vmatmul.mubr.msk.f32.vlgmr.msra.gmra.mrb[4].mxu1 %vm1101_vm1, %v2894_v44  ;;  %v2758_v44 = vpack.c.bf16 %v1536_v43, %v1529_v41  ;;  %v2744_v41 = vpack.c.bf16 %v1589_v40, %v1582_v39  ;;  %v1604_v43 = vld [vmem:[%s4164_s15 + $0x270] sm:$0xff] }
 0x227   : > { %2429 = vmatprep.mubr.msk.f32.mxu1 %vm2996_vm0, %v2997_v1  ;;  %2686 = vmatpush3.bf16.msra.mxu1 %v2685_v47  ;;  %v2760_v47 = vpack.c.bf16 %v1535_v46, %v1528_v45  ;;  %v1606_v46 = vld [vmem:[%s4164_s15 + $0x280] sm:$0xff] }
 0x228   : > { %2687 = vmatprep.subr.bf16.mxu1 %v2995_v51 }
 0x2f9   : > { %v1171_v49 = vpop.f32.mrb[4].mxu1 }
 0x2fa   : > { %v1172_v50 = vadd.f32 %v2120_v48, %v1171_v49  ;;  %v2424_v52 = vpop.f32.mrb[5].mxu1  ;;  %v1543_v48 = vld [vmem:[%s4164_s15 + $0x88] sm:$0xff]  ;;  %v1550_v49 = vld [vmem:[%s4164_s15 + $0xc0] sm:$0xff] }
 0x2fb   : > { %v1542_v52 = vld [vmem:[%s4164_s15 + $0x80] sm:$0xff] }
 0x2fc   : > { %2895 = vtanh.f32 %v1172_v50  ;;  %v2762_v50 = vpack.c.bf16 %v1550_v49, %v1543_v48  ;;  %v2764_v54 = vpack.c.bf16 %v1549_v53, %v1542_v52  ;;  %v1603_v48 = vld [vmem:[%s4164_s15 + $0x268] sm:$0xff]  ;;  %v1598_v52 = vld [vmem:[%s4164_s15 + $0x240] sm:$0xff]  ;;  %v1605_v53 = vld [vmem:[%s4164_s15 + $0x278] sm:$0xff] }
 0x306   : > { %v2896_v58 = vpop.eup %2895 }
 0x307   : > { %2430 = vmatmul.mubr.msk.f32.vlgmr.msra.gmra.mrb[6].mxu1 %vm1185_vm2, %v2896_v58  ;;  %v1556_v58 = vld [vmem:[%s4164_s15 + $0xf0] sm:$0xff] }
 0x308   : > { %2689 = vmatpush3.bf16.msra.mxu1 %v2688_v55  ;;  %2464 = vmatprep.mubr.msk.f32.mxu1 %vm2996_vm0, %v2997_v1  ;;  %v1557_v55 = vld [vmem:[%s4164_s15 + $0xf8] sm:$0xff] }
 0x309   : > { %2690 = vmatprep.subr.bf16.mxu1 %v2995_v51  ;;  %v2766_v57 = vpack.c.bf16 %v1564_v56, %v1557_v55  ;;  %v1611_v55 = vld [vmem:[%s4164_s15 + $0x2a8] sm:$0xff]  ;;  %v1618_v56 = vld [vmem:[%s4164_s15 + $0x2e0] sm:$0xff] }
 0x30c   : > { %2692 = vmatpush3.bf16.msra.mxu1 %v2691_v59  ;;  %v1563_v59 = vld [vmem:[%s4164_s15 + $0x128] sm:$0xff] }
 0x30d   : > { %2693 = vmatprep.subr.bf16.mxu1 %v2995_v51  ;;  %v2768_v60 = vpack.c.bf16 %v1563_v59, %v1556_v58  ;;  %v2750_v58 = vpack.c.bf16 %v1618_v56, %v1611_v55  ;;  %v1620_v59 = vld [vmem:[%s4164_s15 + $0x2f0] sm:$0xff]  ;;  %v1587_v55 = vld [vmem:[%s4164_s15 + $0x1e8] sm:$0xff]  ;;  %v1594_v56 = vld [vmem:[%s4164_s15 + $0x220] sm:$0xff] }
 0x310   : > { %2695 = vmatpush3.bf16.msra.mxu1 %v2694_v62  ;;  %v1578_v62 = vld [vmem:[%s4164_s15 + $0x1a0] sm:$0xff] }
 0x311   : > { %2696 = vmatprep.subr.bf16.mxu1 %v2995_v51  ;;  %v2770_v63 = vpack.c.bf16 %v1578_v62, %v1571_v61  ;;  %v1617_v61 = vld [vmem:[%s4164_s15 + $0x2d8] sm:$0xff] }
 0x314   : > { %2698 = vmatpush3.bf16.msra.mxu1 %v2697_v2  ;;  %v1577_v2 = vld [vmem:[%s4164_s15 + $0x198] sm:$0xff] }
 0x315   : > { %2699 = vmatprep.subr.bf16.mxu1 %v2995_v51  ;;  %v2772_v3 = vpack.c.bf16 %v1577_v2, %v1570_v0  ;;  %v1612_v0 = vld [vmem:[%s4164_s15 + $0x2b0] sm:$0xff]  ;;  %v1619_v2 = vld [vmem:[%s4164_s15 + $0x2e8] sm:$0xff] }
 0x318   : > { %2701 = vmatpush3.bf16.msra.mxu1 %v2700_v5  ;;  %v1592_v5 = vld [vmem:[%s4164_s15 + $0x210] sm:$0xff] }
 0x319   : > { %2702 = vmatprep.subr.bf16.mxu1 %v2995_v51  ;;  %v2774_v6 = vpack.c.bf16 %v1592_v5, %v1585_v4  ;;  %v2784_v4 = vpack.c.bf16 %v1619_v2, %v1612_v0  ;;  %v1632_v5 = vld [vmem:[%s4164_s15 + $0x350] sm:$0xff]  ;;  %v1601_v0 = vld [vmem:[%s4164_s15 + $0x258] sm:$0xff] }
 0x31a   : > { %v1608_v2 = vld [vmem:[%s4164_s15 + $0x290] sm:$0xff] }
 0x31c   : > { %2704 = vmatpush3.bf16.msra.mxu1 %v2703_v8  ;;  %v1591_v8 = vld [vmem:[%s4164_s15 + $0x208] sm:$0xff] }
 0x31d   : > { %2705 = vmatprep.subr.bf16.mxu1 %v2995_v51  ;;  %v2776_v9 = vpack.c.bf16 %v1591_v8, %v1584_v7  ;;  %v1634_v7 = vld [vmem:[%s4164_s15 + $0x360] sm:$0xff] }
 0x320   : > { %2707 = vmatpush3.bf16.msra.mxu1 %v2706_v11 }
 0x321   : > { %2708 = vmatprep.subr.bf16.mxu1 %v2995_v51 }
 0x324   : > { %2710 = vmatpush3.bf16.msra.mxu1 %v2709_v14  ;;  %v1526_v14 = vld [vmem:[%s4164_s15] sm:$0xff] }
 0x325   : > { %2759 = vmatprep.subr.bf16.mxu1 %v2758_v44  ;;  %v1599_v44 = vld [vmem:[%s4164_s15 + $0x248] sm:$0xff] }
 0x326   : > { %v2778_v49 = vpack.c.bf16 %v1606_v46, %v1599_v44  ;;  %v1560_v44 = vld [vmem:[%s4164_s15 + $0x110] sm:$0xff]  ;;  %v1573_v46 = vld [vmem:[%s4164_s15 + $0x178] sm:$0xff] }
 0x3da   : > { %v1255_v16 = vpop.f32.mrb[6].mxu1 }
 0x3db   : > { %v1256_v17 = vadd.f32 %v2122_v15, %v1255_v16  ;;  %v2431_v18 = vpop.f32.mrb[7].mxu1  ;;  %v1533_v15 = vld [vmem:[%s4164_s15 + $0x38] sm:$0xff] }
 0x3dc   : > { %v1541_v16 = vld [vmem:[%s4164_s15 + $0x78] sm:$0xff]  ;;  %v2728_v18 = vpack.c.bf16 %v1533_v15, %v1526_v14  ;;  %v1531_v15 = vld [vmem:[%s4164_s15 + $0x28] sm:$0xff] }
 0x3dd   : > { %1259 = vst [vmem:[%s584_s18] sm:$0xff] %v1256_v17  ;;  %2465 = vmatmul.mubr.f32.vlgmr.msra.gmra.mrb[8].mxu1 %v1256_v17  ;;  %v1548_v17 = vld [vmem:[%s4164_s15 + $0xb0] sm:$0xff]  ;;  %v1633_v14 = vld [vmem:[%s4164_s15 + $0x358] sm:$0xff]  ;;  %s2998_s18 = smov [#allocation2]  }
 0x3de   : > { %1810 = vmatprep.mubr.f32.mxu1 %v2997_v1  ;;  %2761 = vmatpush1.bf16.msra.mxu1 %v2760_v47  ;;  %v2730_v19 = vpack.c.bf16 %v1548_v17, %v1541_v16  ;;  %v1596_v47 = vld [vmem:[%s4164_s15 + $0x230] sm:$0xff]  ;;  %v1538_v16 = vld [vmem:[%s4164_s15 + $0x60] sm:$0xff]  ;;  %s2935_s1 = sshll.u32 %s2998_s18, 4  ;;  %s2936_s1 = int_to_ptr.vmem [resolvable:$false] %s2935_s1 }
 0x3df   : > { %2763 = vmatprep.subr.bf16.mxu1 %v2762_v50  ;;  %v2748_v50 = vpack.c.bf16 %v1603_v48, %v1596_v47  ;;  %v1580_v47 = vld [vmem:[%s4164_s15 + $0x1b0] sm:$0xff]  ;;  %s2937_s27 = scalar_lea.vmem %s2936_s1, 1792  ;;  %p2938_p0 = scmp.lt.s32.totalorder %s4105_s22, %s2936_s1 }
 0x3e0   : > { %p2939_p1 = scmp.lt.s32.totalorder %s2937_s27, %s2931_s21 }
 0x3e2   : > { %2765 = vmatpush1.bf16.msra.mxu1 %v2764_v54  ;;  %v2780_v54 = vpack.c.bf16 %v1605_v53, %v1598_v52  ;;  %v2802_v52 = vpack.c.bf16 %v1580_v47, %v1573_v46  ;;  %v1579_v53 = vld [vmem:[%s4164_s15 + $0x1a8] sm:$0xff]  ;;  %p2940_p2 = por %p2939_p1, %p2938_p0 }
 0x3e3   : > { %2767 = vmatprep.subr.bf16.mxu1 %v2766_v57  ;;  %v1613_v57 = vld [vmem:[%s4164_s15 + $0x2b8] sm:$0xff] }
 0x3e4   : > { %v2782_v62 = vpack.c.bf16 %v1620_v59, %v1613_v57  ;;  %v1586_v59 = vld [vmem:[%s4164_s15 + $0x1e0] sm:$0xff]  ;;  %p2941_p3 = pnand %p2940_p2, %p2934_p13 }
 0x3e6   : > { %2769 = vmatpush1.bf16.msra.mxu1 %v2768_v60  ;;  %v1610_v60 = vld [vmem:[%s4164_s15 + $0x2a0] sm:$0xff] }
 0x3e7   : > { %2771 = vmatprep.subr.bf16.mxu1 %v2770_v63  ;;  %v2752_v63 = vpack.c.bf16 %v1617_v61, %v1610_v60  ;;  %v2806_v60 = vpack.c.bf16 %v1594_v56, %v1587_v55  ;;  %v1593_v61 = vld [vmem:[%s4164_s15 + $0x218] sm:$0xff] }
 0x3ea   : > { %2773 = vmatpush1.bf16.msra.mxu1 %v2772_v3  ;;  %v1625_v3 = vld [vmem:[%s4164_s15 + $0x318] sm:$0xff] }
 0x3eb   : > { %2775 = vmatprep.subr.bf16.mxu1 %v2774_v6  ;;  %v1627_v6 = vld [vmem:[%s4164_s15 + $0x328] sm:$0xff]  ;;  %v2754_v8 = vpack.c.bf16 %v1632_v5, %v1625_v3  ;;  %v2808_v3 = vpack.c.bf16 %v1593_v61, %v1586_v59  ;;  %v1600_v5 = vld [vmem:[%s4164_s15 + $0x250] sm:$0xff] }
 0x3ee   : > { %2777 = vmatpush1.bf16.msra.mxu1 %v2776_v9  ;;  %v2786_v9 = vpack.c.bf16 %v1634_v7, %v1627_v6  ;;  %v2810_v6 = vpack.c.bf16 %v1608_v2, %v1601_v0  ;;  %v1607_v7 = vld [vmem:[%s4164_s15 + $0x288] sm:$0xff] }
 0x3ef   : > { %2779 = vmatprep.subr.bf16.mxu1 %v2778_v49 }
 0x3f2   : > { %2781 = vmatpush1.bf16.msra.mxu1 %v2780_v54  ;;  %v1581_v54 = vld [vmem:[%s4164_s15 + $0x1b8] sm:$0xff] }
 0x3f3   : > { %2783 = vmatprep.subr.bf16.mxu1 %v2782_v62  ;;  %v1588_v62 = vld [vmem:[%s4164_s15 + $0x1f0] sm:$0xff] }
 0x3f6   : > { %2785 = vmatpush1.bf16.msra.mxu1 %v2784_v4 }
 0x3f7   : > { %2787 = vmatprep.subr.bf16.mxu1 %v2786_v9  ;;  %v1609_v9 = vld [vmem:[%s4164_s15 + $0x298] sm:$0xff] }
 0x4b0   : > { %v1349_v23 = vpop.f32.mrb[8].mxu1 }
 0x4b1   : > { %v1350_v24 = vadd.f32 %v2124_v22, %v1349_v23  ;;  %v2466_v25 = vpop.f32.mrb[9].mxu1  ;;  %v1555_v23 = vld [vmem:[%s4164_s15 + $0xe8] sm:$0xff] }
 0x4b2   : > { %v2732_v25 = vpack.c.bf16 %v1547_v21, %v1540_v20 }
 0x4b3   : > { %2897 = vtanh.f32 %v1350_v24  ;;  %v1562_v24 = vld [vmem:[%s4164_s15 + $0x120] sm:$0xff] }
 0x4b4   : > { %v2734_v26 = vpack.c.bf16 %v1562_v24, %v1555_v23  ;;  %v1530_v23 = vld [vmem:[%s4164_s15 + $0x20] sm:$0xff]  ;;  %v1537_v24 = vld [vmem:[%s4164_s15 + $0x58] sm:$0xff] }
 0x4bd   : > { %v2898_v29 = vpop.eup %2897 }
 0x4be   : > { %2472 = vmatmul.mubr.msk.f32.vlgmr.msra.gmra.mrb[6].mxu0 %vm1185_vm2, %v2898_v29  ;;  %v1569_v29 = vld [vmem:[%s4164_s15 + $0x158] sm:$0xff] }
 0x4bf   : > { %2716 = vmatpush3.bf16.msra.mxu0 %v2715_v28  ;;  %2490 = vmatprep.mubr.msk.f32.mxu0 %vm2996_vm0, %v2997_v1  ;;  %v1561_v28 = vld [vmem:[%s4164_s15 + $0x118] sm:$0xff] }
 0x4c0   : > { %2717 = vmatprep.subr.bf16.mxu0 %v2995_v51  ;;  %v2736_v31 = vpack.c.bf16 %v1561_v28, %v1554_v27  ;;  %v1545_v27 = vld [vmem:[%s4164_s15 + $0x98] sm:$0xff]  ;;  %v1552_v28 = vld [vmem:[%s4164_s15 + $0xd0] sm:$0xff] }
 0x4c3   : > { %2719 = vmatpush3.bf16.msra.mxu0 %v2718_v32  ;;  %v2738_v32 = vpack.c.bf16 %v1576_v30, %v1569_v29  ;;  %v2792_v29 = vpack.c.bf16 %v1537_v24, %v1530_v23  ;;  %v1628_v23 = vld [vmem:[%s4164_s15 + $0x330] sm:$0xff] }
 0x4c4   : > { %2720 = vmatprep.subr.bf16.mxu0 %v2995_v51 }
 0x4c7   : > { %2722 = vmatpush3.bf16.msra.mxu0 %v2721_v35  ;;  %v1583_v35 = vld [vmem:[%s4164_s15 + $0x1c8] sm:$0xff] }
 0x4c8   : > { %2723 = vmatprep.subr.bf16.mxu0 %v2995_v51 }
 0x4cb   : > { %2725 = vmatpush3.bf16.msra.mxu0 %v2724_v38  ;;  %v2742_v38 = vpack.c.bf16 %v1590_v36, %v1583_v35  ;;  %v1553_v35 = vld [vmem:[%s4164_s15 + $0xd8] sm:$0xff] }
 0x4cc   : > { %2727 = vmatprep.subr.bf16.mxu0 %v2726_v42  ;;  %v1597_v42 = vld [vmem:[%s4164_s15 + $0x238] sm:$0xff]  ;;  %v2826_v40 = vpack.c.bf16 %v1553_v35, %v1546_v34  ;;  %v1638_v34 = vld [vmem:[%s4165_s16] sm:$0xff] }
 0x4cd   : > { %v2746_v45 = vpack.c.bf16 %v1604_v43, %v1597_v42  ;;  %v1565_v43 = vld [vmem:[%s4164_s15 + $0x138] sm:$0xff] }
 0x591   : > { %v1432_v11 = vpop.f32.mrb[6].mxu0 }
 0x592   : > { %v1433_v12 = vadd.f32 %v2125_v10, %v1432_v11  ;;  %v2473_v13 = vpop.f32.mrb[7].mxu0  ;;  %v1624_v10 = vld [vmem:[%s4164_s15 + $0x310] sm:$0xff]  ;;  %v1631_v11 = vld [vmem:[%s4164_s15 + $0x348] sm:$0xff] }
 0x593   : > { %v2756_v13 = vpack.c.bf16 %v1631_v11, %v1624_v10  ;;  %v1615_v10 = vld [vmem:[%s4164_s15 + $0x2c8] sm:$0xff]  ;;  %v1622_v11 = vld [vmem:[%s4164_s15 + $0x300] sm:$0xff] }
 0x594   : > { %2899 = vtanh.f32 %v1433_v12  ;;  %v1626_v12 = vld [vmem:[%s4164_s15 + $0x320] sm:$0xff] }
 0x595   : > { %v2788_v17 = vpack.c.bf16 %v1633_v14, %v1626_v12  ;;  %v2812_v12 = vpack.c.bf16 %v1607_v7, %v1600_v5  ;;  %v1614_v14 = vld [vmem:[%s4164_s15 + $0x2c0] sm:$0xff] }
 0x597   : > { %2789 = vmatpush1.bf16.msra.mxu1 %v2788_v17  ;;  %v1616_v17 = vld [vmem:[%s4164_s15 + $0x2d0] sm:$0xff] }
 0x598   : > { %2822 = vmatprep.subr.bf16.mxu1 %v2995_v51 }
 0x59e   : > { %v2900_v22 = vpop.eup %2899 }
 0x59f   : > { %2491 = vmatmul.mubr.msk.f32.vlgmr.msra.gmra.mrb[8].mxu0 %vm1101_vm1, %v2900_v22 }
 0x5a0   : > { %2729 = vmatpush1.bf16.msra.mxu0 %v2728_v18  ;;  %1739 = vmatprep.mubr.f32.mxu0 %v2997_v1  ;;  %v2790_v18 = vpack.c.bf16 %v1538_v16, %v1531_v15  ;;  %v2814_v15 = vpack.c.bf16 %v1622_v11, %v1615_v10  ;;  %v1621_v16 = vld [vmem:[%s4164_s15 + $0x2f8] sm:$0xff] }
 0x5a1   : > { %2731 = vmatprep.subr.bf16.mxu0 %v2730_v19  ;;  %v2127_v19 = vld [vmem:[%s4163_s14] ss:$0 sm:$0xff] }
 0x5a4   : > { %2733 = vmatpush1.bf16.msra.mxu0 %v2732_v25  ;;  %v1532_v25 = vld [vmem:[%s4164_s15 + $0x30] sm:$0xff] }
 0x5a5   : > { %2735 = vmatprep.subr.bf16.mxu0 %v2734_v26  ;;  %v1539_v26 = vld [vmem:[%s4164_s15 + $0x68] sm:$0xff] }
 0x5a6   : > { %v2823_v30 = vpack.c.bf16 %v1539_v26, %v1532_v25  ;;  %v1635_v25 = vld [vmem:[%s4164_s15 + $0x368] sm:$0xff]  ;;  %v1630_v26 = vld [vmem:[%s4164_s15 + $0x340] sm:$0xff] }
 0x5a8   : > { %2737 = vmatpush1.bf16.msra.mxu0 %v2736_v31  ;;  %v1544_v31 = vld [vmem:[%s4164_s15 + $0x90] sm:$0xff] }
 0x5a9   : > { %2739 = vmatprep.subr.bf16.mxu0 %v2738_v32  ;;  %v2794_v32 = vpack.c.bf16 %v1552_v28, %v1545_v27  ;;  %v2796_v39 = vpack.c.bf16 %v1551_v33, %v1544_v31  ;;  %v1637_v27 = vld [vmem:[%s4164_s15 + $0x378] sm:$0xff]  ;;  %v2820_v28 = vpack.c.bf16 %v1635_v25, %v1628_v23 }
 0x5ac   : > { %2741 = vmatpush1.bf16.msra.mxu0 %v2740_v37  ;;  %v1559_v37 = vld [vmem:[%s4164_s15 + $0x108] sm:$0xff] }
 0x5ad   : > { %2743 = vmatprep.subr.bf16.mxu0 %v2742_v38  ;;  %v1566_v38 = vld [vmem:[%s4164_s15 + $0x140] sm:$0xff] }
 0x5ae   : > { %v2798_v42 = vpack.c.bf16 %v1566_v38, %v1559_v37 }
 0x5b0   : > { %2745 = vmatpush1.bf16.msra.mxu0 %v2744_v41  ;;  %v1558_v41 = vld [vmem:[%s4164_s15 + $0x100] sm:$0xff] }
 0x5b1   : > { %2747 = vmatprep.subr.bf16.mxu0 %v2746_v45  ;;  %v1567_v45 = vld [vmem:[%s4164_s15 + $0x148] sm:$0xff]  ;;  %v2800_v48 = vpack.c.bf16 %v1565_v43, %v1558_v41 }
 0x5b2   : > { %v2829_v49 = vpack.c.bf16 %v1567_v45, %v1560_v44 }
 0x5b4   : > { %2749 = vmatpush1.bf16.msra.mxu0 %v2748_v50  ;;  %v1572_v50 = vld [vmem:[%s4164_s15 + $0x170] sm:$0xff] }
 0x5b5   : > { %2751 = vmatprep.subr.bf16.mxu0 %v2750_v58  ;;  %v2804_v57 = vpack.c.bf16 %v1579_v53, %v1572_v50 }
 0x5b8   : > { %2753 = vmatpush1.bf16.msra.mxu0 %v2752_v63  ;;  %v1595_v63 = vld [vmem:[%s4164_s15 + $0x228] sm:$0xff] }
 0x5b9   : > { %2755 = vmatprep.subr.bf16.mxu0 %v2754_v8  ;;  %v2835_v4 = vpack.c.bf16 %v1595_v63, %v1588_v62  ;;  %v1602_v8 = vld [vmem:[%s4164_s15 + $0x260] sm:$0xff] }
 0x5bc   : > { %2757 = vmatpush1.bf16.msra.mxu0 %v2756_v13  ;;  %v2838_v13 = vpack.c.bf16 %v1609_v9, %v1602_v8 }
 0x5bd   : > { %2791 = vmatprep.subr.bf16.mxu0 %v2790_v18  ;;  %v1623_v18 = vld [vmem:[%s4164_s15 + $0x308] sm:$0xff] }
 0x672   : > { %v1521_v20 = vpop.f32.mrb[8].mxu0 }
 0x673   : > { %v1522_v21 = vadd.f32 %v2127_v19, %v1521_v20  ;;  %v2492_v22 = vpop.f32.mrb[9].mxu0  ;;  %v1629_v19 = vld [vmem:[%s4164_s15 + $0x338] sm:$0xff]  ;;  %v1636_v20 = vld [vmem:[%s4164_s15 + $0x370] sm:$0xff] }
 0x674   : > { %v2841_v22 = vpack.c.bf16 %v1623_v18, %v1616_v17  ;;  %v2818_v24 = vpack.c.bf16 %v1636_v20, %v1629_v19 }
 0x675   : > { %2901 = vtanh.f32 %v1522_v21  ;;  %v2816_v21 = vpack.c.bf16 %v1621_v16, %v1614_v14 }
 0x67f   : > { %v3961_v36 = vpop.eup %2901 }
 0x680   : > { %1740 = vmatmul.mubr.f32.vlgmr.msra.gmra.mrb[10].mxu0 %v3961_v36  ;;  %1811 = vmatmul.mubr.f32.vlgmr.msra.gmra.mrb[10].mxu1 %v3961_v36 }
 0x681   : > { %2793 = vmatpush1.bf16.msra.mxu0 %v2792_v29  ;;  %2824 = vmatpush3.bf16.msra.mxu1 %v2823_v30  ;;  %v2844_v29 = vpack.c.bf16 %v1637_v27, %v1630_v26  ;;  %v1640_v30 = vlaneseq }
 0x682   : > { %2795 = vmatprep.subr.bf16.mxu0 %v2794_v32  ;;  %2825 = vmatprep.subr.bf16.mxu1 %v2995_v51 }
 0x683   : > { %1881 = vmatprep.mubr.f32.mxu0 %v2997_v1  ;;  %2525 = vmatprep.mubr.msk.f32.mxu1 %vm2996_vm0, %v2997_v1  ;;  %v1574_v1 = vld [vmem:[%s4164_s15 + $0x180] sm:$0xff]  ;;  %v1641_v31 = vshrl.u32 %v1640_v30, 7 }
 0x684   : > { %v2832_v58 = vpack.c.bf16 %v1581_v54, %v1574_v1 }
 0x685   : > { %2797 = vmatpush1.bf16.msra.mxu0 %v2796_v39  ;;  %2827 = vmatpush3.bf16.msra.mxu1 %v2826_v40  ;;  %v1642_v32 = vsub.s32 0, %v1641_v31  ;;  %v1650_v33 = vsub.s32 2, %v1641_v31  ;;  %v1646_v35 = vsub.s32 1, %v1641_v31  ;;  %v1654_v37 = vsub.s32 3, %v1641_v31 }
 0x686   : > { %2799 = vmatprep.subr.bf16.mxu0 %v2798_v42  ;;  %2828 = vmatprep.subr.bf16.mxu1 %v2995_v51  ;;  %v1666_v61 = vsub.s32 6, %v1641_v31  ;;  %v1662_v62 = vsub.s32 5, %v1641_v31 }
 0x687   : > { %v1643_v38 = vrot.slane %v1638_v34, %v1642_v32  ;;  %v1651_v39 = vrot.slane %v1638_v34, %v1650_v33  ;;  %v1647_v40 = vrot.slane %v1638_v34, %v1646_v35 }
 0x688   : > { %v1663_v5 = vrot.slane %v1638_v34, %v1662_v62 }
 0x689   : > { %2801 = vmatpush1.bf16.msra.mxu0 %v2800_v48  ;;  %2830 = vmatpush3.bf16.msra.mxu1 %v2829_v49 }
 0x68a   : > { %2803 = vmatprep.subr.bf16.mxu0 %v2802_v52  ;;  %2831 = vmatprep.subr.bf16.mxu1 %v2995_v51 }
 0x68d   : > { %2805 = vmatpush1.bf16.msra.mxu0 %v2804_v57  ;;  %2833 = vmatpush3.bf16.msra.mxu1 %v2832_v58 }
 0x68e   : > { %2807 = vmatprep.subr.bf16.mxu0 %v2806_v60  ;;  %2834 = vmatprep.subr.bf16.mxu1 %v2995_v51  ;;  %v1658_v60 = vsub.s32 4, %v1641_v31 }
 0x690   : > { %v1659_v2 = vrot.slane %v1638_v34, %v1658_v60 }
 0x691   : > { %2809 = vmatpush1.bf16.msra.mxu0 %v2808_v3  ;;  %2836 = vmatpush3.bf16.msra.mxu1 %v2835_v4  ;;  %v1667_v3 = vrot.slane %v1638_v34, %v1666_v61 }
 0x692   : > { %2811 = vmatprep.subr.bf16.mxu0 %v2810_v6  ;;  %2837 = vmatprep.subr.bf16.mxu1 %v2995_v51 }
 0x695   : > { %2813 = vmatpush1.bf16.msra.mxu0 %v2812_v12  ;;  %2839 = vmatpush3.bf16.msra.mxu1 %v2838_v13 }
 0x696   : > { %2815 = vmatprep.subr.bf16.mxu0 %v2814_v15  ;;  %2840 = vmatprep.subr.bf16.mxu1 %v2995_v51 }
 0x699   : > { %2817 = vmatpush1.bf16.msra.mxu0 %v2816_v21  ;;  %2842 = vmatpush3.bf16.msra.mxu1 %v2841_v22 }
 0x69a   : > { %2819 = vmatprep.subr.bf16.mxu0 %v2818_v24  ;;  %2843 = vmatprep.subr.bf16.mxu1 %v2995_v51  ;;  %v1655_v51 = vrot.slane %v1638_v34, %v1654_v37 }
 0x69d   : > { %2821 = vmatpush1.bf16.msra.mxu0 %v2820_v28  ;;  %2845 = vmatpush3.bf16.msra.mxu1 %v2844_v29 }
 0x6a0   : > { %1882 = vmatmul.mubr.f32.vlgmr.msra.gmra.mrb[12].mxu0 %v3961_v36  ;;  %2526 = vmatmul.mubr.f32.vlgmr.msra.gmra.mrb[12].mxu1 %v3961_v36 }
 0x753   : > { %v1741_v41 = vpop.f32.mrb[10].mxu0  ;;  %v1812_v42 = vpop.f32.mrb[10].mxu1 }
 0x754   : > { %v1742_v43 = vadd.f32 %v1741_v41, %v1643_v38  ;;  %v1813_v44 = vadd.f32 %v1812_v42, %v1651_v39  ;;  %v1743_v45 = vpop.f32.mrb[11].mxu0  ;;  %v1814_v36 = vpop.f32.mrb[11].mxu1 }
 0x755   : > { %v1744_v46 = vadd.f32 %v1743_v45, %v1647_v40  ;;  %v1815_v47 = vadd.f32 %v1814_v36, %v1655_v51 }
 0x756   : > { %v2129_v48 = vmul.f32 -1.442695, %v1742_v43  ;;  %v2131_v49 = vmul.f32 -1.442695, %v1813_v44 }
 0x757   : > { %v2130_v50 = vmul.f32 -1.442695, %v1744_v46  ;;  %v2132_v52 = vmul.f32 -1.442695, %v1815_v47 }
 0x758   : > { %2903 = vpow2.f32 %v2129_v48 }
 0x759   : > { %2905 = vpow2.f32 %v2131_v49 }
 0x75a   : > { %2907 = vpow2.f32 %v2130_v50 }
 0x75b   : > { %2909 = vpow2.f32 %v2132_v52 }
 0x762   : > { %v2904_v53 = vpop.eup %2903 }
 0x763   : > { %v2906_v1 = vpop.eup %2905  ;;  %v1979_v54 = vadd.f32 1.0, %v2904_v53 }
 0x764   : > { %v2908_v55 = vpop.eup %2907  ;;  %v1981_v56 = vadd.f32 1.0, %v2906_v1 }
 0x765   : > { %v2910_v57 = vpop.eup %2909  ;;  %2911 = vrcp.f32 %v1979_v54  ;;  %v1980_v58 = vadd.f32 1.0, %v2908_v55 }
 0x766   : > { %2913 = vrcp.f32 %v1981_v56  ;;  %v1982_v59 = vadd.f32 1.0, %v2910_v57 }
 0x767   : > { %2915 = vrcp.f32 %v1980_v58 }
 0x768   : > { %2917 = vrcp.f32 %v1982_v59 }
 0x76f   : > { %v2912_v63 = vpop.eup %2911 }
 0x770   : > { %v2914_v0 = vpop.eup %2913  ;;  %2000 = vst [vmem:[%s4091_s29] sm:$0xff] %v2912_v63 }
 0x771   : > { %v2916_v4 = vpop.eup %2915  ;;  %2002 = vst [vmem:[%s4091_s29 + $0x10] sm:$0xff] %v2914_v0 }
 0x772   : > { %v2918_v6 = vpop.eup %2917  ;;  %2001 = vst [vmem:[%s4091_s29 + $0x8] sm:$0xff] %v2916_v4 }
 0x773   : > { %2003 = vst [vmem:[%s4091_s29 + $0x18] sm:$0xff] %v2918_v6  ;;  %v1883_v7 = vpop.f32.mrb[12].mxu0  ;;  %v1954_v8 = vpop.f32.mrb[12].mxu1 }
 0x774   : > { %v1884_v9 = vadd.f32 %v1883_v7, %v1659_v2  ;;  %v1955_v10 = vadd.f32 %v1954_v8, %v1667_v3  ;;  %v1885_v11 = vpop.f32.mrb[13].mxu0  ;;  %v2527_v12 = vpop.f32.mrb[13].mxu1 }
 0x775   : > { %v1886_v13 = vadd.f32 %v1885_v11, %v1663_v5 }
 0x776   : > { %v2133_v14 = vmul.f32 -1.442695, %v1884_v9  ;;  %v2135_v15 = vmul.f32 -1.442695, %v1955_v10 }
 0x777   : > { %v2134_v16 = vmul.f32 -1.442695, %v1886_v13 }
 0x778   : > { %2919 = vpow2.f32 %v2133_v14 }
 0x779   : > { %2921 = vpow2.f32 %v2135_v15 }
 0x77a   : > { %2923 = vpow2.f32 %v2134_v16 }
 0x782   : > { %v2920_v17 = vpop.eup %2919 }
 0x783   : > { %v2922_v18 = vpop.eup %2921  ;;  %v1983_v19 = vadd.f32 1.0, %v2920_v17 }
 0x784   : > { %v2924_v20 = vpop.eup %2923  ;;  %v1985_v21 = vadd.f32 1.0, %v2922_v18 }
 0x785   : > { %2925 = vrcp.f32 %v1983_v19  ;;  %v1984_v22 = vadd.f32 1.0, %v2924_v20 }
 0x786   : > { %2927 = vrcp.f32 %v1985_v21 }
 0x787   : > { %2929 = vrcp.f32 %v1984_v22 }
 0x78f   : > { %v2926_v23 = vpop.eup %2925 }
 0x790   : > { %v2928_v24 = vpop.eup %2927  ;;  %2004 = vst [vmem:[%s4091_s29 + $0x20] sm:$0xff] %v2926_v23 }
 0x791   : > { %v2930_v25 = vpop.eup %2929  ;;  %2006 = vst [vmem:[%s4091_s29 + $0x30] sm:$0xff] %v2928_v24 }
 0x792   : > { %2005 = vst [vmem:[%s4091_s29 + $0x28] sm:$0xff] %v2930_v25 }
 0x793   : > { %2944 = shalt.err (!%p2941_p3)
}
 0x794   : > { %s2945_s19 = scalar_lea.hbm %s4103_s24, 896  ;;  %s2949_s20 = scalar_lea.hbm %s4198_s2, 1792 }
 0x795   : > { %p2946_p4 = scmp.ne.s32.totalorder %s4103_s24, %s2945_s19  ;;  %p2950_p9 = scmp.lt.u32.totalorder %s4103_s24, %s4198_s2 }
 0x796   : > { %p2951_p10 = scmp.lt.u32.totalorder %s2949_s20, %s2945_s19  ;;  %p2953_p12 = scmp.lt.u32.totalorder %s2945_s19, %s4103_s24 }
 0x797   : > { %p2947_p7 = pnand %p2946_p4, %p3132_p5 }
 0x798   : > { %p2952_p11 = por %p2951_p10, %p2950_p9 }
 0x799   : > { %p2948_p8 = pneg %p2947_p7 }
 0x79a   : > { %p2954_p13 = por %p2953_p12, %p2952_p11 }
 0x79c   : > { %p2955_p0 = pnand %p2954_p13, %p2948_p8 }
 0x79e   : > { %2958 = shalt.err (!%p2955_p0)
}
 0x79f   : > { %2849 = dma.vmem_to_hbm [thread:$0]  (%p3132_p5), %s4105_s22, 896, %s4103_s24, %s2012_s25  }
 0x7a0 PF: > { %s4199_s21 = sld [smem:[#allocation7_spill]]  ;;  %s4200_s1 = sld [smem:[#allocation5_spill]] }
 0x7a6   : > { %p2855_p1 = scmp.ge.s32.totalorder %s4199_s21, 2  ;;  %s2048_s29 = sand.u32 1, %s4200_s1  }
 0x7a7   : > { %s2049_s30 = scalar_lea.sflag [#allocation3], %s2048_s29 }
 0x7a8   : > { %p2852_p2 = pnand %p2855_p1, %p3136_p6 }
 0x7aa   : > { %2976 = dma.done.wait (!%p2852_p2), %s2049_s30, 896  }
 0x7ab   : > { %2978 = vsyncadd (!%p2852_p2), %s2049_s30, 4294966400  ;;  %s4202_s30 = sld [smem:[#allocation9_spill]]  ;;  %s4203_s19 = sld [smem:[#allocation6_spill]] }
 0x7ac   : > { %s4204_s29 = sld [smem:[#allocation10_spill]]  ;;  %s4205_s27 = smov %s2985_s28 }
 0x7b1   : > { %p29_p3 = scmp.ge.s32.totalorder %s4202_s30, 4   ;;  %s4206_s28 = smov %s4203_s19 }
 0x7b3   :  { %31 = sbr.rel (!%p29_p3) target bundleno = 8 (0x8), region = 135 }
 0x7ba   :  { %2054 = vsyncpa [#allocation3], 1 }
 0x7bb   :  { %2056 = vsyncpa [#allocation3 + $0x1], 1 }

</bundles_post_ra>
